<compile_context>
chip_gen: v7x
topology: tpu7x:2x2x1
jax: 0.10.0
libtpu: 0.0.40
codegen_flags: <defaults>
</compile_context>

<pallas_src>
import jax
import jax.numpy as jnp
from jax.experimental import pallas as pl
from jax.experimental.pallas import tpu as pltpu

# Lane-aligned (padded) feature dims.
_K1 = 28 * 28          # 784 (equals full array dim -> no extra x traffic)
_N1 = 384              # 300 -> 384
_N2 = 128              # 100 -> 128
_N3 = 128              # 10  -> 128
_NUM_CLASSES = 10
_NEG_LARGE = -1e30     # finite "minus infinity" for padded class lanes


def _round_up(n, m):
    return ((n + m - 1) // m) * m


def _buffered_supported():
    """Probe whether this jax exposes BlockSpec(pipeline_mode=pl.Buffered(k))."""
    if not hasattr(pl, "Buffered"):
        return False
    try:
        pl.BlockSpec((8, 128), lambda i: (0, 0), pipeline_mode=pl.Buffered(1))
    except TypeError:
        return False
    return True


_BUFFERED_OK = _buffered_supported()


def _leneta_kernel(x_ref, mask_ref, w1_ref, b1_ref, w2_ref, b2_ref, w3_ref, b3_ref, o_ref):
    # x arrives as f32 straight from HBM; bf16 cast on the VPU is free under the DMA.
    x = x_ref[...].astype(jnp.bfloat16)
    # fc1: bf16 x bf16 -> f32 MXU accumulate; bias add + ReLU in f32.
    h1 = jnp.dot(x, w1_ref[...], preferred_element_type=jnp.float32)
    h1 = jnp.maximum(h1 + b1_ref[...], 0.0)
    # fc2
    h2 = jnp.dot(h1.astype(jnp.bfloat16), w2_ref[...], preferred_element_type=jnp.float32)
    h2 = jnp.maximum(h2 + b2_ref[...], 0.0)
    # output layer (ReLU on the logits matches the PyTorch module)
    z = jnp.dot(h2.astype(jnp.bfloat16), w3_ref[...], preferred_element_type=jnp.float32)
    z = jnp.maximum(z + b3_ref[...], 0.0)
    # Additive mask: 0 on the 10 real classes, -1e30 on padded lanes -> padded
    # lanes contribute exp(~-1e30)=0 to the normalizer and stay finite.
    z = z + mask_ref[...]
    # log_softmax over the class axis (exp/log on the EUP, max/sum on the XLU).
    m = jnp.max(z, axis=-1, keepdims=True)
    s = z - m
    lse = jnp.log(jnp.sum(jnp.exp(s), axis=-1, keepdims=True))
    o_ref[...] = (s - lse).astype(o_ref.dtype)


def _pick_tb(batch, tb_cap):
    """Batch tile: multiple of 8, capped at tb_cap, and sized so that the grid
    has >= 2 tiles whenever the batch allows it (keeps both v7x TensorCores
    busy via dimension_semantics=("parallel",)); also keeps batch padding small."""
    tb_cap = max(8, _round_up(int(tb_cap), 8))
    if batch <= 8:
        return 8
    half = _round_up((batch + 1) // 2, 8)
    return min(tb_cap, half)


def _vmem_limit_bytes(tb):
    """VMEM budget incl. compiler-materialized intermediates, with 30% slack.

    x f32 tile (double-buffered) + out f32 tile (double-buffered) + resident
    weights/biases (conservatively counted double-buffered) + per-tile
    temporaries (x bf16, h1 f32+bf16, h2 f32+bf16, z f32, softmax temps).
    Clamped to [32 MiB, 64 MiB]: above v5e's 16 MiB scoped default, below
    v7x's 64 MiB-per-TC physical VMEM.
    """
    x_bytes = 2 * tb * _K1 * 4
    out_bytes = 2 * tb * _N3 * 4
    weights = 2 * ((_K1 * _N1 + _N1 * _N2 + _N2 * _N3) * 2 + (_N1 + _N2 + 2 * _N3) * 4)
    inter = tb * (_K1 * 2 + _N1 * 6 + _N2 * 6 + _N3 * 16)
    est = int((x_bytes + out_bytes + weights + inter) * 1.3)
    return int(min(64 << 20, max(32 << 20, est)))


def _make_call(*, tb, b_pad, grid, cost, vmem_limit, use_buffered):
    def resident(shape):
        if use_buffered:
            # Constant index_map => DMA'd once; a single buffer saves VMEM.
            return pl.BlockSpec(shape, lambda i: (0, 0), pipeline_mode=pl.Buffered(1))
        return pl.BlockSpec(shape, lambda i: (0, 0))

    in_specs = [
        pl.BlockSpec((tb, _K1), lambda i: (i, 0)),   # x (f32): streamed, auto double-buffered
        resident((1, _N3)),                          # class mask
        resident((_K1, _N1)), resident((1, _N1)),    # w1, b1
        resident((_N1, _N2)), resident((1, _N2)),    # w2, b2
        resident((_N2, _N3)), resident((1, _N3)),    # w3, b3
    ]
    return pl.pallas_call(
        _leneta_kernel,
        out_shape=jax.ShapeDtypeStruct((b_pad, _N3), jnp.float32),
        grid=grid,
        in_specs=in_specs,
        out_specs=pl.BlockSpec((tb, _N3), lambda i: (i, 0)),
        compiler_params=pltpu.CompilerParams(
            dimension_semantics=("parallel",),
            vmem_limit_bytes=vmem_limit,
        ),
        cost_estimate=cost,
    )


def leneta_forward(x_nchw, padded_params, *, tb=1024):
    """x_nchw: (B, 1, 28, 28) float32. padded_params: output of prepare_params()."""
    w1, b1, w2, b2, w3, b3, cmask = padded_params
    B = x_nchw.shape[0]

    # Flatten only (free reshape of contiguous data); NO dtype cast here -- the
    # bf16 cast happens inside the kernel to avoid an extra HBM pass over x.
    x = x_nchw.reshape(B, _K1).astype(jnp.float32)

    TB = _pick_tb(B, tb)
    B_pad = _round_up(B, TB)
    if B_pad != B:
        x = jnp.pad(x, ((0, B_pad - B), (0, 0)))
    grid = (B_pad // TB,)

    flops = 2 * B_pad * (_K1 * _N1 + _N1 * _N2 + _N2 * _N3)
    bytes_accessed = (
        B_pad * _K1 * 4                                   # x (f32)
        + (_K1 * _N1 + _N1 * _N2 + _N2 * _N3) * 2         # weights (bf16)
        + (_N1 + _N2 + 2 * _N3) * 4                       # biases + mask (f32)
        + B_pad * _N3 * 4                                 # output (f32)
    )
    cost = pl.CostEstimate(
        flops=flops, transcendentals=B_pad * (_N3 + 1), bytes_accessed=bytes_accessed
    )
    vmem_limit = _vmem_limit_bytes(TB)

    args = (x, cmask, w1, b1, w2, b2, w3, b3)
    try:
        out = _make_call(tb=TB, b_pad=B_pad, grid=grid, cost=cost,
                         vmem_limit=vmem_limit, use_buffered=_BUFFERED_OK)(*args)
    except Exception:
        if not _BUFFERED_OK:
            raise
        # Fallback: identical kernel without the Buffered(1) pipelining hint.
        out = _make_call(tb=TB, b_pad=B_pad, grid=grid, cost=cost,
                         vmem_limit=vmem_limit, use_buffered=False)(*args)

    return out[:B, :_NUM_CLASSES]


def init_params(key):
    """PyTorch-style Linear init at the module's natural (unpadded) shapes."""
    k1, k2, k3, k4, k5, k6 = jax.random.split(key, 6)

    def lin(kw, kb, fan_in, fan_out):
        bound = 1.0 / jnp.sqrt(jnp.float32(fan_in))
        w = jax.random.uniform(kw, (fan_in, fan_out), jnp.float32, -bound, bound)
        b = jax.random.uniform(kb, (1, fan_out), jnp.float32, -bound, bound)
        return w, b

    w1, b1 = lin(k1, k2, _K1, 300)
    w2, b2 = lin(k3, k4, 300, 100)
    w3, b3 = lin(k5, k6, 100, 10)
    return (w1, b1, w2, b2, w3, b3)


def prepare_params(params):
    """One-time: zero-pad feature dims to lane multiples, cast weights to bf16,
    and build the additive class-padding mask."""
    w1, b1, w2, b2, w3, b3 = params

    def pad2(a, rows, cols):
        return jnp.pad(a, ((0, rows - a.shape[0]), (0, cols - a.shape[1])))

    w1p = pad2(w1, _K1, _N1).astype(jnp.bfloat16)
    b1p = pad2(b1, 1, _N1).astype(jnp.float32)
    w2p = pad2(w2, _N1, _N2).astype(jnp.bfloat16)
    b2p = pad2(b2, 1, _N2).astype(jnp.float32)
    w3p = pad2(w3, _N2, _N3).astype(jnp.bfloat16)
    b3p = pad2(b3, 1, _N3).astype(jnp.float32)
    cmask = jnp.where(jnp.arange(_N3) < _NUM_CLASSES, 0.0, _NEG_LARGE)
    cmask = cmask.reshape(1, _N3).astype(jnp.float32)
    return (w1p, b1p, w2p, b2p, w3p, b3p, cmask)


def _reference_f32(x_nchw, params):
    """Pure f32 reference of the original PyTorch forward."""
    w1, b1, w2, b2, w3, b3 = params
    x = x_nchw.reshape(x_nchw.shape[0], -1).astype(jnp.float32)
    h1 = jnp.maximum(x @ w1 + b1, 0.0)
    h2 = jnp.maximum(h1 @ w2 + b2, 0.0)
    z = jnp.maximum(h2 @ w3 + b3, 0.0)
    return jax.nn.log_softmax(z, axis=1)


def _reference_bf16(x_nchw, padded_params):
    """Reference with the same bf16-operand / f32-accumulate recipe as the kernel."""
    w1, b1, w2, b2, w3, b3, _ = padded_params
    x = x_nchw.reshape(x_nchw.shape[0], -1).astype(jnp.bfloat16)
    h1 = jnp.maximum(jnp.dot(x, w1, preferred_element_type=jnp.float32) + b1, 0.0)
    h2 = jnp.maximum(
        jnp.dot(h1.astype(jnp.bfloat16), w2, preferred_element_type=jnp.float32) + b2, 0.0
    )
    z = jnp.maximum(
        jnp.dot(h2.astype(jnp.bfloat16), w3, preferred_element_type=jnp.float32) + b3, 0.0
    )
    return jax.nn.log_softmax(z[:, :_NUM_CLASSES], axis=1)


if __name__ == "__main__":
    key = jax.random.PRNGKey(0)
    kx, kp = jax.random.split(key)

    params = init_params(kp)
    padded_params = prepare_params(params)

    # Small deterministic example, MNIST-like NCHW input.
    B = 2
    x = jax.random.normal(kx, (B, 1, 28, 28), jnp.float32)

    out = leneta_forward(x, padded_params)
    out = jax.block_until_ready(out)
    assert out.shape == (B, _NUM_CLASSES)

    # Tight check vs. a reference using the identical bf16/f32 recipe.
    ref_bf16 = _reference_bf16(x, padded_params)
    assert jnp.allclose(out, ref_bf16, atol=1e-4, rtol=1e-4), "mismatch vs bf16-matched reference"

    # Semantics sanity check vs. the pure-f32 PyTorch-equivalent forward
    # (looser tolerance: weights/activations are quantized to bf16 on the MXU).
    ref_f32 = _reference_f32(x, params)
    assert jnp.allclose(out, ref_f32, atol=5e-2), "mismatch vs f32 reference"

    # Exercise the multi-tile / padded-batch path (grid >= 2 tiles, B % TB != 0).
    B2 = 20
    x2 = jax.random.normal(kx, (B2, 1, 28, 28), jnp.float32)
    out2 = jax.block_until_ready(leneta_forward(x2, padded_params))
    assert out2.shape == (B2, _NUM_CLASSES)
    assert jnp.allclose(out2, _reference_bf16(x2, padded_params), atol=1e-4, rtol=1e-4), \
        "mismatch on multi-tile / padded batch"
    assert bool(jnp.all(jnp.isfinite(out2))), "non-finite values in output"

    print("KERNEL_OK")
</pallas_src>

<mosaic_0001>
module attributes {stable_mosaic.version = 11 : i64} {
  func.func @_leneta_kernel(%arg0: i32, %arg1: memref<8x784xf32, #tpu.memory_space<vmem>>, %arg2: memref<1x128xf32, #tpu.memory_space<vmem>>, %arg3: memref<784x384xbf16, #tpu.memory_space<vmem>>, %arg4: memref<1x384xf32, #tpu.memory_space<vmem>>, %arg5: memref<384x128xbf16, #tpu.memory_space<vmem>>, %arg6: memref<1x128xf32, #tpu.memory_space<vmem>>, %arg7: memref<128x128xbf16, #tpu.memory_space<vmem>>, %arg8: memref<1x128xf32, #tpu.memory_space<vmem>>, %arg9: memref<8x128xf32, #tpu.memory_space<vmem>>) attributes {dimension_semantics = [#tpu.dimension_semantics<parallel>], iteration_bounds = array<i64: 1>, scalar_prefetch = 0 : i64, scratch_operands = 0 : i64, tpu.core_type = #tpu.core_type<tc>, window_params = [{transform_indices = @transform_0, window_bounds = array<i64: 8, 784>}, {pipeline_mode = #tpu.pipeline_mode<synchronous>, transform_indices = @transform_1, window_bounds = array<i64: 1, 128>}, {pipeline_mode = #tpu.pipeline_mode<synchronous>, transform_indices = @transform_2, window_bounds = array<i64: 784, 384>}, {pipeline_mode = #tpu.pipeline_mode<synchronous>, transform_indices = @transform_3, window_bounds = array<i64: 1, 384>}, {pipeline_mode = #tpu.pipeline_mode<synchronous>, transform_indices = @transform_4, window_bounds = array<i64: 384, 128>}, {pipeline_mode = #tpu.pipeline_mode<synchronous>, transform_indices = @transform_5, window_bounds = array<i64: 1, 128>}, {pipeline_mode = #tpu.pipeline_mode<synchronous>, transform_indices = @transform_6, window_bounds = array<i64: 128, 128>}, {pipeline_mode = #tpu.pipeline_mode<synchronous>, transform_indices = @transform_7, window_bounds = array<i64: 1, 128>}, {transform_indices = @transform_8, window_bounds = array<i64: 8, 128>}]} {
    %c0 = arith.constant 0 : index
    %c0_0 = arith.constant 0 : index
    %0 = vector.load %arg1[%c0, %c0_0] : memref<8x784xf32, #tpu.memory_space<vmem>>, vector<8x784xf32>
    %1 = arith.truncf %0 : vector<8x784xf32> to vector<8x784xbf16>
    %c0_1 = arith.constant 0 : index
    %c0_2 = arith.constant 0 : index
    %2 = vector.load %arg3[%c0_1, %c0_2] : memref<784x384xbf16, #tpu.memory_space<vmem>>, vector<784x384xbf16>
    %cst = arith.constant dense<0.000000e+00> : vector<8x384xf32>
    %3 = tpu.matmul %1, %2, %cst {dimension_numbers = #tpu.dot_dimension_numbers<[1], [0], [0], [1], [0, 0, 1, 1], [], []>} : vector<8x784xbf16>, vector<784x384xbf16>, vector<8x384xf32> -> vector<8x384xf32>
    %c0_3 = arith.constant 0 : index
    %c0_4 = arith.constant 0 : index
    %4 = vector.load %arg4[%c0_3, %c0_4] : memref<1x384xf32, #tpu.memory_space<vmem>>, vector<1x384xf32>
    %5 = vector.broadcast %4 : vector<1x384xf32> to vector<8x384xf32>
    %6 = arith.addf %3, %5 : vector<8x384xf32>
    %cst_5 = arith.constant 0.000000e+00 : f32
    %7 = vector.broadcast %cst_5 : f32 to vector<8x384xf32>
    %8 = arith.maximumf %6, %7 : vector<8x384xf32>
    %9 = arith.truncf %8 : vector<8x384xf32> to vector<8x384xbf16>
    %c0_6 = arith.constant 0 : index
    %c0_7 = arith.constant 0 : index
    %10 = vector.load %arg5[%c0_6, %c0_7] : memref<384x128xbf16, #tpu.memory_space<vmem>>, vector<384x128xbf16>
    %cst_8 = arith.constant dense<0.000000e+00> : vector<8x128xf32>
    %11 = tpu.matmul %9, %10, %cst_8 {dimension_numbers = #tpu.dot_dimension_numbers<[1], [0], [0], [1], [0, 0, 1, 1], [], []>} : vector<8x384xbf16>, vector<384x128xbf16>, vector<8x128xf32> -> vector<8x128xf32>
    %c0_9 = arith.constant 0 : index
    %c0_10 = arith.constant 0 : index
    %12 = vector.load %arg6[%c0_9, %c0_10] : memref<1x128xf32, #tpu.memory_space<vmem>>, vector<1x128xf32>
    %13 = vector.broadcast %12 : vector<1x128xf32> to vector<8x128xf32>
    %14 = arith.addf %11, %13 : vector<8x128xf32>
    %cst_11 = arith.constant 0.000000e+00 : f32
    %15 = vector.broadcast %cst_11 : f32 to vector<8x128xf32>
    %16 = arith.maximumf %14, %15 : vector<8x128xf32>
    %17 = arith.truncf %16 : vector<8x128xf32> to vector<8x128xbf16>
    %c0_12 = arith.constant 0 : index
    %c0_13 = arith.constant 0 : index
    %18 = vector.load %arg7[%c0_12, %c0_13] : memref<128x128xbf16, #tpu.memory_space<vmem>>, vector<128x128xbf16>
    %cst_14 = arith.constant dense<0.000000e+00> : vector<8x128xf32>
    %19 = tpu.matmul %17, %18, %cst_14 {dimension_numbers = #tpu.dot_dimension_numbers<[1], [0], [0], [1], [0, 0, 1, 1], [], []>} : vector<8x128xbf16>, vector<128x128xbf16>, vector<8x128xf32> -> vector<8x128xf32>
    %c0_15 = arith.constant 0 : index
    %c0_16 = arith.constant 0 : index
    %20 = vector.load %arg8[%c0_15, %c0_16] : memref<1x128xf32, #tpu.memory_space<vmem>>, vector<1x128xf32>
    %21 = vector.broadcast %20 : vector<1x128xf32> to vector<8x128xf32>
    %22 = arith.addf %19, %21 : vector<8x128xf32>
    %cst_17 = arith.constant 0.000000e+00 : f32
    %23 = vector.broadcast %cst_17 : f32 to vector<8x128xf32>
    %24 = arith.maximumf %22, %23 : vector<8x128xf32>
    %c0_18 = arith.constant 0 : index
    %c0_19 = arith.constant 0 : index
    %25 = vector.load %arg2[%c0_18, %c0_19] : memref<1x128xf32, #tpu.memory_space<vmem>>, vector<1x128xf32>
    %26 = vector.broadcast %25 : vector<1x128xf32> to vector<8x128xf32>
    %27 = arith.addf %24, %26 : vector<8x128xf32>
    %cst_20 = arith.constant dense<0xFF800000> : vector<8xf32>
    %28 = vector.multi_reduction <maximumf>, %27, %cst_20 [1] : vector<8x128xf32> to vector<8xf32>
    %29 = vector.shape_cast %28 : vector<8xf32> to vector<8x1xf32>
    %30 = vector.broadcast %29 : vector<8x1xf32> to vector<8x128xf32>
    %31 = arith.subf %27, %30 : vector<8x128xf32>
    %32 = math.exp %31 : vector<8x128xf32>
    %cst_21 = arith.constant dense<0.000000e+00> : vector<8xf32>
    %33 = vector.multi_reduction <add>, %32, %cst_21 [1] : vector<8x128xf32> to vector<8xf32>
    %34 = vector.shape_cast %33 : vector<8xf32> to vector<8x1xf32>
    %35 = math.log %34 : vector<8x1xf32>
    %36 = vector.broadcast %35 : vector<8x1xf32> to vector<8x128xf32>
    %37 = arith.subf %31, %36 : vector<8x128xf32>
    %c0_22 = arith.constant 0 : index
    %c0_23 = arith.constant 0 : index
    %38 = vector.load %arg9[%c0_22, %c0_23] : memref<8x128xf32, #tpu.memory_space<vmem>>, vector<8x128xf32>
    tpu.vector_store %arg9[%c0_22, %c0_23], %37 {strides = array<i32>} : memref<8x128xf32, #tpu.memory_space<vmem>>, vector<8x128xf32>,
    return
  }
  func.func @transform_0(%arg0: i32) -> (i32, i32) {
    %c0_i32 = arith.constant 0 : i32
    %c0_i32_0 = arith.constant 0 : i32
    return %arg0, %c0_i32 : i32, i32
  }
  func.func @transform_1(%arg0: i32) -> (i32, i32) {
    %c0_i32 = arith.constant 0 : i32
    %c0_i32_0 = arith.constant 0 : i32
    %c0_i32_1 = arith.constant 0 : i32
    return %c0_i32, %c0_i32_0 : i32, i32
  }
  func.func @transform_2(%arg0: i32) -> (i32, i32) {
    %c0_i32 = arith.constant 0 : i32
    %c0_i32_0 = arith.constant 0 : i32
    %c0_i32_1 = arith.constant 0 : i32
    return %c0_i32, %c0_i32_0 : i32, i32
  }
  func.func @transform_3(%arg0: i32) -> (i32, i32) {
    %c0_i32 = arith.constant 0 : i32
    %c0_i32_0 = arith.constant 0 : i32
    %c0_i32_1 = arith.constant 0 : i32
    return %c0_i32, %c0_i32_0 : i32, i32
  }
  func.func @transform_4(%arg0: i32) -> (i32, i32) {
    %c0_i32 = arith.constant 0 : i32
    %c0_i32_0 = arith.constant 0 : i32
    %c0_i32_1 = arith.constant 0 : i32
    return %c0_i32, %c0_i32_0 : i32, i32
  }
  func.func @transform_5(%arg0: i32) -> (i32, i32) {
    %c0_i32 = arith.constant 0 : i32
    %c0_i32_0 = arith.constant 0 : i32
    %c0_i32_1 = arith.constant 0 : i32
    return %c0_i32, %c0_i32_0 : i32, i32
  }
  func.func @transform_6(%arg0: i32) -> (i32, i32) {
    %c0_i32 = arith.constant 0 : i32
    %c0_i32_0 = arith.constant 0 : i32
    %c0_i32_1 = arith.constant 0 : i32
    return %c0_i32, %c0_i32_0 : i32, i32
  }
  func.func @transform_7(%arg0: i32) -> (i32, i32) {
    %c0_i32 = arith.constant 0 : i32
    %c0_i32_0 = arith.constant 0 : i32
    %c0_i32_1 = arith.constant 0 : i32
    return %c0_i32, %c0_i32_0 : i32, i32
  }
  func.func @transform_8(%arg0: i32) -> (i32, i32) {
    %c0_i32 = arith.constant 0 : i32
    %c0_i32_0 = arith.constant 0 : i32
    return %arg0, %c0_i32 : i32, i32
  }
}

module attributes {stable_mosaic.version = 11 : i64} {
  func.func @_leneta_kernel(%arg0: i32, %arg1: memref<8x784xf32, #tpu.memory_space<vmem>>, %arg2: memref<1x128xf32, #tpu.memory_space<vmem>>, %arg3: memref<784x384xbf16, #tpu.memory_space<vmem>>, %arg4: memref<1x384xf32, #tpu.memory_space<vmem>>, %arg5: memref<384x128xbf16, #tpu.memory_space<vmem>>, %arg6: memref<1x128xf32, #tpu.memory_space<vmem>>, %arg7: memref<128x128xbf16, #tpu.memory_space<vmem>>, %arg8: memref<1x128xf32, #tpu.memory_space<vmem>>, %arg9: memref<8x128xf32, #tpu.memory_space<vmem>>) attributes {dimension_semantics = [#tpu.dimension_semantics<parallel>], iteration_bounds = array<i64: 1>, scalar_prefetch = 0 : i64, scratch_operands = 0 : i64, tpu.core_type = #tpu.core_type<tc>, window_params = [{transform_indices = @transform_0, window_bounds = array<i64: 8, 784>}, {pipeline_mode = #tpu.pipeline_mode<synchronous>, transform_indices = @transform_1, window_bounds = array<i64: 1, 128>}, {pipeline_mode = #tpu.pipeline_mode<synchronous>, transform_indices = @transform_2, window_bounds = array<i64: 784, 384>}, {pipeline_mode = #tpu.pipeline_mode<synchronous>, transform_indices = @transform_3, window_bounds = array<i64: 1, 384>}, {pipeline_mode = #tpu.pipeline_mode<synchronous>, transform_indices = @transform_4, window_bounds = array<i64: 384, 128>}, {pipeline_mode = #tpu.pipeline_mode<synchronous>, transform_indices = @transform_5, window_bounds = array<i64: 1, 128>}, {pipeline_mode = #tpu.pipeline_mode<synchronous>, transform_indices = @transform_6, window_bounds = array<i64: 128, 128>}, {pipeline_mode = #tpu.pipeline_mode<synchronous>, transform_indices = @transform_7, window_bounds = array<i64: 1, 128>}, {transform_indices = @transform_8, window_bounds = array<i64: 8, 128>}]} {
    %c0 = arith.constant 0 : index
    %c0_0 = arith.constant 0 : index
    %0 = vector.load %arg1[%c0, %c0_0] : memref<8x784xf32, #tpu.memory_space<vmem>>, vector<8x784xf32>
    %1 = arith.truncf %0 : vector<8x784xf32> to vector<8x784xbf16>
    %c0_1 = arith.constant 0 : index
    %c0_2 = arith.constant 0 : index
    %2 = vector.load %arg3[%c0_1, %c0_2] : memref<784x384xbf16, #tpu.memory_space<vmem>>, vector<784x384xbf16>
    %cst = arith.constant dense<0.000000e+00> : vector<8x384xf32>
    %3 = tpu.matmul %1, %2, %cst {dimension_numbers = #tpu.dot_dimension_numbers<[1], [0], [0], [1], [0, 0, 1, 1], [], []>} : vector<8x784xbf16>, vector<784x384xbf16>, vector<8x384xf32> -> vector<8x384xf32>
    %c0_3 = arith.constant 0 : index
    %c0_4 = arith.constant 0 : index
    %4 = vector.load %arg4[%c0_3, %c0_4] : memref<1x384xf32, #tpu.memory_space<vmem>>, vector<1x384xf32>
    %5 = vector.broadcast %4 : vector<1x384xf32> to vector<8x384xf32>
    %6 = arith.addf %3, %5 : vector<8x384xf32>
    %cst_5 = arith.constant 0.000000e+00 : f32
    %7 = vector.broadcast %cst_5 : f32 to vector<8x384xf32>
    %8 = arith.maximumf %6, %7 : vector<8x384xf32>
    %9 = arith.truncf %8 : vector<8x384xf32> to vector<8x384xbf16>
    %c0_6 = arith.constant 0 : index
    %c0_7 = arith.constant 0 : index
    %10 = vector.load %arg5[%c0_6, %c0_7] : memref<384x128xbf16, #tpu.memory_space<vmem>>, vector<384x128xbf16>
    %cst_8 = arith.constant dense<0.000000e+00> : vector<8x128xf32>
    %11 = tpu.matmul %9, %10, %cst_8 {dimension_numbers = #tpu.dot_dimension_numbers<[1], [0], [0], [1], [0, 0, 1, 1], [], []>} : vector<8x384xbf16>, vector<384x128xbf16>, vector<8x128xf32> -> vector<8x128xf32>
    %c0_9 = arith.constant 0 : index
    %c0_10 = arith.constant 0 : index
    %12 = vector.load %arg6[%c0_9, %c0_10] : memref<1x128xf32, #tpu.memory_space<vmem>>, vector<1x128xf32>
    %13 = vector.broadcast %12 : vector<1x128xf32> to vector<8x128xf32>
    %14 = arith.addf %11, %13 : vector<8x128xf32>
    %cst_11 = arith.constant 0.000000e+00 : f32
    %15 = vector.broadcast %cst_11 : f32 to vector<8x128xf32>
    %16 = arith.maximumf %14, %15 : vector<8x128xf32>
    %17 = arith.truncf %16 : vector<8x128xf32> to vector<8x128xbf16>
    %c0_12 = arith.constant 0 : index
    %c0_13 = arith.constant 0 : index
    %18 = vector.load %arg7[%c0_12, %c0_13] : memref<128x128xbf16, #tpu.memory_space<vmem>>, vector<128x128xbf16>
    %cst_14 = arith.constant dense<0.000000e+00> : vector<8x128xf32>
    %19 = tpu.matmul %17, %18, %cst_14 {dimension_numbers = #tpu.dot_dimension_numbers<[1], [0], [0], [1], [0, 0, 1, 1], [], []>} : vector<8x128xbf16>, vector<128x128xbf16>, vector<8x128xf32> -> vector<8x128xf32>
    %c0_15 = arith.constant 0 : index
    %c0_16 = arith.constant 0 : index
    %20 = vector.load %arg8[%c0_15, %c0_16] : memref<1x128xf32, #tpu.memory_space<vmem>>, vector<1x128xf32>
    %21 = vector.broadcast %20 : vector<1x128xf32> to vector<8x128xf32>
    %22 = arith.addf %19, %21 : vector<8x128xf32>
    %cst_17 = arith.constant 0.000000e+00 : f32
    %23 = vector.broadcast %cst_17 : f32 to vector<8x128xf32>
    %24 = arith.maximumf %22, %23 : vector<8x128xf32>
    %c0_18 = arith.constant 0 : index
    %c0_19 = arith.constant 0 : index
    %25 = vector.load %arg2[%c0_18, %c0_19] : memref<1x128xf32, #tpu.memory_space<vmem>>, vector<1x128xf32>
    %26 = vector.broadcast %25 : vector<1x128xf32> to vector<8x128xf32>
    %27 = arith.addf %24, %26 : vector<8x128xf32>
    %cst_20 = arith.constant dense<0xFF800000> : vector<8xf32>
    %28 = vector.multi_reduction <maximumf>, %27, %cst_20 [1] : vector<8x128xf32> to vector<8xf32>
    %29 = vector.shape_cast %28 : vector<8xf32> to vector<8x1xf32>
    %30 = vector.broadcast %29 : vector<8x1xf32> to vector<8x128xf32>
    %31 = arith.subf %27, %30 : vector<8x128xf32>
    %32 = math.exp %31 : vector<8x128xf32>
    %cst_21 = arith.constant dense<0.000000e+00> : vector<8xf32>
    %33 = vector.multi_reduction <add>, %32, %cst_21 [1] : vector<8x128xf32> to vector<8xf32>
    %34 = vector.shape_cast %33 : vector<8xf32> to vector<8x1xf32>
    %35 = math.log %34 : vector<8x1xf32>
    %36 = vector.broadcast %35 : vector<8x1xf32> to vector<8x128xf32>
    %37 = arith.subf %31, %36 : vector<8x128xf32>
    %c0_22 = arith.constant 0 : index
    %c0_23 = arith.constant 0 : index
    %38 = vector.load %arg9[%c0_22, %c0_23] : memref<8x128xf32, #tpu.memory_space<vmem>>, vector<8x128xf32>
    tpu.vector_store %arg9[%c0_22, %c0_23], %37 {strides = array<i32>} : memref<8x128xf32, #tpu.memory_space<vmem>>, vector<8x128xf32>,
    return
  }
  func.func @transform_0(%arg0: i32) -> (i32, i32) {
    %c0_i32 = arith.constant 0 : i32
    %c0_i32_0 = arith.constant 0 : i32
    return %arg0, %c0_i32 : i32, i32
  }
  func.func @transform_1(%arg0: i32) -> (i32, i32) {
    %c0_i32 = arith.constant 0 : i32
    %c0_i32_0 = arith.constant 0 : i32
    %c0_i32_1 = arith.constant 0 : i32
    return %c0_i32, %c0_i32_0 : i32, i32
  }
  func.func @transform_2(%arg0: i32) -> (i32, i32) {
    %c0_i32 = arith.constant 0 : i32
    %c0_i32_0 = arith.constant 0 : i32
    %c0_i32_1 = arith.constant 0 : i32
    return %c0_i32, %c0_i32_0 : i32, i32
  }
  func.func @transform_3(%arg0: i32) -> (i32, i32) {
    %c0_i32 = arith.constant 0 : i32
    %c0_i32_0 = arith.constant 0 : i32
    %c0_i32_1 = arith.constant 0 : i32
    return %c0_i32, %c0_i32_0 : i32, i32
  }
  func.func @transform_4(%arg0: i32) -> (i32, i32) {
    %c0_i32 = arith.constant 0 : i32
    %c0_i32_0 = arith.constant 0 : i32
    %c0_i32_1 = arith.constant 0 : i32
    return %c0_i32, %c0_i32_0 : i32, i32
  }
  func.func @transform_5(%arg0: i32) -> (i32, i32) {
    %c0_i32 = arith.constant 0 : i32
    %c0_i32_0 = arith.constant 0 : i32
    %c0_i32_1 = arith.constant 0 : i32
    return %c0_i32, %c0_i32_0 : i32, i32
  }
  func.func @transform_6(%arg0: i32) -> (i32, i32) {
    %c0_i32 = arith.constant 0 : i32
    %c0_i32_0 = arith.constant 0 : i32
    %c0_i32_1 = arith.constant 0 : i32
    return %c0_i32, %c0_i32_0 : i32, i32
  }
  func.func @transform_7(%arg0: i32) -> (i32, i32) {
    %c0_i32 = arith.constant 0 : i32
    %c0_i32_0 = arith.constant 0 : i32
    %c0_i32_1 = arith.constant 0 : i32
    return %c0_i32, %c0_i32_0 : i32, i32
  }
  func.func @transform_8(%arg0: i32) -> (i32, i32) {
    %c0_i32 = arith.constant 0 : i32
    %c0_i32_0 = arith.constant 0 : i32
    return %arg0, %c0_i32 : i32, i32
  }
}

</mosaic_0001>

<bundles_post_ra>
// kernel: tpu_custom_call.1
= control target key start
LH: loop header
LB: loop body
LE: loop exit
PB: predicated region body
PF: predicated region fallthrough
CT: control target
= control target key end

     0   :  { %13 = vsyncpa [#allocation3], 0  ;;  %s2738_s0 = inlined_call_operand.hbm [shape: f32[8,784], index: 0, kind: input, shape index: {}]   ;;  %s2739_s1 = inlined_call_operand.vmem [shape: f32[1,128], index: 1, kind: input, shape index: {}]   ;;  %s2740_s2 = inlined_call_operand.hbm [shape: bf16[784,384], index: 2, kind: input, shape index: {}]   ;;  %s2741_s3 = inlined_call_operand.vmem [shape: f32[1,384], index: 3, kind: input, shape index: {}]   ;;  %s2742_s4 = inlined_call_operand.hbm [shape: bf16[384,128], index: 4, kind: input, shape index: {}]   ;;  %s2743_s5 = inlined_call_operand.vmem [shape: f32[1,128], index: 5, kind: input, shape index: {}]   ;;  %s2744_s6 = inlined_call_operand.hbm [shape: bf16[128,128], index: 6, kind: input, shape index: {}]   ;;  %s2745_s7 = inlined_call_operand.vmem [shape: f32[1,128], index: 7, kind: input, shape index: {}]   ;;  %s2746_s8 = inlined_call_operand.hbm [shape: f32[8,128], index: 8, kind: output, shape index: {}]  }
   0x1   :  { %14 = vsyncpa [#allocation6], 0 }
   0x2   :  { %15 = vsyncpa [#allocation9], 0 }
   0x3   :  { %16 = vsyncpa [#allocation4], 0  ;;  %s2572_s27 = smov [#allocation5]   ;;  %s2454_s9 = scalar_lea.hbm %s2740_s2, 18816 }
   0x4   :  { %s34_s28 = sshll.u32 %s2572_s27, 4  ;;  %p2455_p0 = scmp.ne.s32.totalorder %s2740_s2, %s2454_s9  ;;  %s35_s28 = int_to_ptr.vmem [resolvable:$true] %s34_s28 }
   0x5   :  { %p2458_p1 = scmp.lt.u32.totalorder %s2454_s9, %s2740_s2 }
   0x7   :  { %p2460_p2 = pnand %p2458_p1, %p2455_p0 }
   0x9   :  { %2463 = shalt.err (!%p2460_p2)
}
   0xa   :  { %s2464_s14 = scalar_lea.vmem %s35_s28, 18816  ;;  %p2469_p4 = scmp.lt.s32.totalorder %s35_s28, %s35_s28 }
   0xb   :  { %p2465_p3 = scmp.ne.s32.totalorder %s35_s28, %s2464_s14  ;;  %p2470_p5 = scmp.lt.s32.totalorder %s2464_s14, %s2464_s14 }
   0xd   :  { %p2471_p6 = por %p2470_p5, %p2469_p4 }
   0xf   :  { %p2472_p7 = pnand %p2471_p6, %p2465_p3 }
  0x11   :  { %2475 = shalt.err (!%p2472_p7)
}
  0x12   :  { %s2573_s15 = smov 192   ;;  %s2574_s16 = smov 12  }
  0x13   :  { %40 = dma.hbm_to_vmem [thread:$0]  %s2740_s2, 18816, %s35_s28, [#allocation6], %s2573_s15, %s2573_s15, %s2574_s16  }
  0x14   :  { %s2575_s19 = smov [#allocation2]   ;;  %s2576_s21 = smov [#allocation7]  }
  0x15   :  { %s23_s20 = sshll.u32 %s2575_s19, 4  ;;  %s48_s22 = sshll.u32 %s2576_s21, 4  ;;  %s24_s20 = int_to_ptr.vmem [resolvable:$true] %s23_s20  ;;  %s49_s22 = int_to_ptr.vmem [resolvable:$true] %s48_s22 }
  0x16   :  { %s2476_s25 = scalar_lea.hbm %s2738_s0, 896 }
  0x17   :  { %p2477_p8 = scmp.ne.s32.totalorder %s2738_s0, %s2476_s25  ;;  %p2480_p9 = scmp.lt.u32.totalorder %s2476_s25, %s2738_s0 }
  0x19   :  { %p2482_p10 = pnand %p2480_p9, %p2477_p8 }
  0x1b   :  { %2485 = shalt.err (!%p2482_p10)
}
  0x1c   :  { %s2486_s2 = scalar_lea.vmem %s24_s20, 896  ;;  %p2491_p12 = scmp.lt.s32.totalorder %s24_s20, %s24_s20 }
  0x1d   :  { %p2487_p11 = scmp.ne.s32.totalorder %s24_s20, %s2486_s2  ;;  %p2492_p13 = scmp.lt.s32.totalorder %s2486_s2, %s2486_s2 }
  0x1f   :  { %p2493_p0 = por %p2492_p13, %p2491_p12 }
  0x21   :  { %p2494_p1 = pnand %p2493_p0, %p2487_p11 }
  0x23   :  { %2497 = shalt.err (!%p2494_p1)
}
  0x24   :  { %26 = dma.hbm_to_vmem [thread:$0]  %s2738_s0, 896, %s24_s20, [#allocation3]  }
  0x25   :  { %s2498_s12 = scalar_lea.hbm %s2742_s4, 3072 }
  0x26   :  { %p2499_p2 = scmp.ne.s32.totalorder %s2742_s4, %s2498_s12  ;;  %p2502_p3 = scmp.lt.u32.totalorder %s2498_s12, %s2742_s4 }
  0x28   :  { %p2504_p4 = pnand %p2502_p3, %p2499_p2 }
  0x2a   :  { %2507 = shalt.err (!%p2504_p4)
}
  0x2b   :  { %s2508_s17 = scalar_lea.vmem %s49_s22, 3072  ;;  %p2513_p6 = scmp.lt.s32.totalorder %s49_s22, %s49_s22 }
  0x2c   :  { %p2509_p5 = scmp.ne.s32.totalorder %s49_s22, %s2508_s17  ;;  %p2514_p7 = scmp.lt.s32.totalorder %s2508_s17, %s2508_s17 }
  0x2e   :  { %p2515_p8 = por %p2514_p7, %p2513_p6 }
  0x30   :  { %p2516_p9 = pnand %p2515_p8, %p2509_p5 }
  0x32   :  { %2519 = shalt.err (!%p2516_p9)
}
  0x33   :  { %s2577_s0 = smov 64   ;;  %s2578_s18 = smov 4  }
  0x34   :  { %54 = dma.hbm_to_vmem [thread:$0]  %s2742_s4, 3072, %s49_s22, [#allocation6], %s2577_s0, %s2577_s0, %s2578_s18  }
  0x35   :  { %s2579_s21 = smov [#allocation8]   ;;  %s2520_s26 = scalar_lea.hbm %s2744_s6, 1024 }
  0x36   :  { %s62_s23 = sshll.u32 %s2579_s21, 4  ;;  %p2521_p10 = scmp.ne.s32.totalorder %s2744_s6, %s2520_s26  ;;  %s63_s23 = int_to_ptr.vmem [resolvable:$true] %s62_s23 }
  0x37   :  { %p2524_p11 = scmp.lt.u32.totalorder %s2520_s26, %s2744_s6 }
  0x39   :  { %p2526_p12 = pnand %p2524_p11, %p2521_p10 }
  0x3b   :  { %2529 = shalt.err (!%p2526_p12)
}
  0x3c   :  { %s2530_s28 = scalar_lea.vmem %s63_s23, 1024  ;;  %p2535_p0 = scmp.lt.s32.totalorder %s63_s23, %s63_s23 }
  0x3d   :  { %p2531_p13 = scmp.ne.s32.totalorder %s63_s23, %s2530_s28  ;;  %p2536_p1 = scmp.lt.s32.totalorder %s2530_s28, %s2530_s28 }
  0x3f   :  { %p2537_p2 = por %p2536_p1, %p2535_p0 }
  0x41   :  { %p2538_p3 = pnand %p2537_p2, %p2531_p13 }
  0x43   :  { %2541 = shalt.err (!%p2538_p3)
}
  0x44   :  { %68 = dma.hbm_to_vmem [thread:$0]  %s2744_s6, 1024, %s63_s23, [#allocation9], %s2577_s0, %s2577_s0, %s2578_s18  }
  0x45   :  { %2564 = dma.done.wait [#allocation3], 896  }
  0x46   :  { %2565 = vsyncadd [#allocation3], 4294966400 }
  0x47   :  { %2566 = dma.done.wait [#allocation6], 21888  }
  0x48   :  { %2567 = vsyncadd [#allocation6], 4294945408 }
  0x49   :  { %2568 = dma.done.wait [#allocation9], 1024  }
  0x4a   :  { %2569 = vsyncadd [#allocation9], 4294966272  ;;  %v2222_v0 = vld [vmem:[#allocation5 + $0x4] ss:$12 sps:$4 sm:$0xff]   ;;  %v2224_v1 = vld [vmem:[#allocation5] ss:$12 sps:$4 sm:$0xff]  }
  0x4b   :  { %1099 = vmatprep.subr.bf16.mxu0 %v2222_v0  ;;  %v2225_v2 = vld [vmem:[#allocation5 + $0x1c] ss:$12 sps:$4 sm:$0xff]   ;;  %v2227_v3 = vld [vmem:[#allocation5 + $0x18] ss:$12 sps:$4 sm:$0xff]   ;;  %v2228_v4 = vld [vmem:[#allocation5 + $0x34] ss:$12 sps:$4 sm:$0xff]  }
  0x4c   :  { %1100 = vmatpush1.bf16.msra.mxu0 %v2224_v1  ;;  %v2230_v5 = vld [vmem:[#allocation5 + $0x30] ss:$12 sps:$4 sm:$0xff]   ;;  %v2231_v6 = vld [vmem:[#allocation5 + $0x4c] ss:$12 sps:$4 sm:$0xff]   ;;  %v2233_v7 = vld [vmem:[#allocation5 + $0x48] ss:$12 sps:$4 sm:$0xff]  }
  0x4d   :  { %1101 = vmatprep.subr.bf16.mxu0 %v2225_v2  ;;  %v2234_v8 = vld [vmem:[#allocation5 + $0x64] ss:$12 sps:$4 sm:$0xff]   ;;  %v2236_v9 = vld [vmem:[#allocation5 + $0x60] ss:$12 sps:$4 sm:$0xff]   ;;  %v2237_v10 = vld [vmem:[#allocation5 + $0x7c] ss:$12 sps:$4 sm:$0xff]  }
  0x4e   :  { %v2239_v11 = vld [vmem:[#allocation5 + $0x78] ss:$12 sps:$4 sm:$0xff]   ;;  %v2240_v12 = vld [vmem:[#allocation5 + $0x94] ss:$12 sps:$4 sm:$0xff]   ;;  %v2242_v15 = vld [vmem:[#allocation5 + $0x90] ss:$12 sps:$4 sm:$0xff]  }
  0x4f   :  { %v85_v13 = vld [vmem:[#allocation2 + $0x8] sm:$0xff]  ;;  %v2243_v16 = vld [vmem:[#allocation5 + $0xac] ss:$12 sps:$4 sm:$0xff]   ;;  %v2249_v24 = vld [vmem:[#allocation5 + $0xdc] ss:$12 sps:$4 sm:$0xff]   ;;  %vm1095_vm0 = vcmask 130048  }
  0x50   :  { %1102 = vmatpush1.bf16.msra.mxu0 %v2227_v3  ;;  %v92_v14 = vpack.c.bf16 %v85_v13, %v85_v13  ;;  %v2276_v17 = vld [vmem:[#allocation5 + $0xc8] ss:$12 sps:$4 sm:$0xff]   ;;  %v2246_v20 = vld [vmem:[#allocation5 + $0xc4] ss:$12 sps:$4 sm:$0xff]   ;;  %v2281_v21 = vld [vmem:[#allocation5 + $0xe0] ss:$12 sps:$4 sm:$0xff]  }
  0x51   :  { %1103 = vmatprep.subr.bf16.mxu0 %v2228_v4  ;;  %v2277_v18 = vld [vmem:[#allocation5 + $0x8] ss:$12 sps:$4 sm:$0xff]   ;;  %2042 = vmatprep.subr.bf16.mxu1 %v2276_v17  ;;  %v2282_v22 = vld [vmem:[#allocation5 + $0x20] ss:$12 sps:$4 sm:$0xff]   ;;  %v2286_v25 = vld [vmem:[#allocation5 + $0xf8] ss:$12 sps:$4 sm:$0xff]  }
  0x52   :  { %1131 = vmatprep.mubr.bf16.mxu0 %v92_v14  ;;  %1295 = vmatprep.mubr.bf16.mxu1 %v92_v14  ;;  %v2245_v19 = vld [vmem:[#allocation5 + $0xa8] ss:$12 sps:$4 sm:$0xff]   ;;  %v2248_v23 = vld [vmem:[#allocation5 + $0xc0] ss:$12 sps:$4 sm:$0xff]   ;;  %v2287_v26 = vld [vmem:[#allocation5 + $0x38] ss:$12 sps:$4 sm:$0xff]  }
  0x53   :  { %2043 = vmatpush3.bf16.msra.mxu1 %v2277_v18  ;;  %v2251_v27 = vld [vmem:[#allocation5 + $0xd8] ss:$12 sps:$4 sm:$0xff]   ;;  %v2252_v28 = vld [vmem:[#allocation5 + $0xf4] ss:$12 sps:$4 sm:$0xff]   ;;  %v2291_v29 = vld [vmem:[#allocation5 + $0x110] ss:$12 sps:$4 sm:$0xff]  }
  0x54   :  { %1104 = vmatpush1.bf16.msra.mxu0 %v2230_v5  ;;  %2044 = vmatprep.subr.bf16.mxu1 %v2281_v21  ;;  %v2292_v30 = vld [vmem:[#allocation5 + $0x50] ss:$12 sps:$4 sm:$0xff]   ;;  %v2296_v32 = vld [vmem:[#allocation5 + $0x128] ss:$12 sps:$4 sm:$0xff]   ;;  %v2255_v33 = vld [vmem:[#allocation5 + $0x10c] ss:$12 sps:$4 sm:$0xff]  }
  0x55   :  { %1105 = vmatprep.subr.bf16.mxu0 %v2231_v6  ;;  %v2254_v31 = vld [vmem:[#allocation5 + $0xf0] ss:$12 sps:$4 sm:$0xff]   ;;  %v2297_v34 = vld [vmem:[#allocation5 + $0x68] ss:$12 sps:$4 sm:$0xff]   ;;  %v2301_v35 = vld [vmem:[#allocation5 + $0x140] ss:$12 sps:$4 sm:$0xff]  }
  0x56   :  { %v2257_v36 = vld [vmem:[#allocation5 + $0x108] ss:$12 sps:$4 sm:$0xff]   ;;  %v2258_v37 = vld [vmem:[#allocation5 + $0x124] ss:$12 sps:$4 sm:$0xff]   ;;  %v2302_v38 = vld [vmem:[#allocation5 + $0x80] ss:$12 sps:$4 sm:$0xff]  }
  0x57   :  { %2045 = vmatpush3.bf16.msra.mxu1 %v2282_v22  ;;  %v2306_v39 = vld [vmem:[#allocation5 + $0x158] ss:$12 sps:$4 sm:$0xff]   ;;  %v2260_v40 = vld [vmem:[#allocation5 + $0x120] ss:$12 sps:$4 sm:$0xff]   ;;  %v2261_v41 = vld [vmem:[#allocation5 + $0x13c] ss:$12 sps:$4 sm:$0xff]  }
  0x58   :  { %1106 = vmatpush1.bf16.msra.mxu0 %v2233_v7  ;;  %2046 = vmatprep.subr.bf16.mxu1 %v2286_v25  ;;  %v2307_v42 = vld [vmem:[#allocation5 + $0x98] ss:$12 sps:$4 sm:$0xff]   ;;  %v2311_v43 = vld [vmem:[#allocation5 + $0x170] ss:$12 sps:$4 sm:$0xff]   ;;  %v2264_v45 = vld [vmem:[#allocation5 + $0x154] ss:$12 sps:$4 sm:$0xff]  }
  0x59   :  { %1107 = vmatprep.subr.bf16.mxu0 %v2234_v8  ;;  %v2263_v44 = vld [vmem:[#allocation5 + $0x138] ss:$12 sps:$4 sm:$0xff]   ;;  %v2312_v46 = vld [vmem:[#allocation5 + $0xb0] ss:$12 sps:$4 sm:$0xff]   ;;  %v2316_v47 = vld [vmem:[#allocation5 + $0x248] ss:$12 sps:$4 sm:$0xff]  }
  0x5a   :  { %v2266_v48 = vld [vmem:[#allocation5 + $0x150] ss:$12 sps:$4 sm:$0xff]   ;;  %v84_v49 = vld [vmem:[#allocation2] sm:$0xff]  ;;  %v2326_v57 = vld [vmem:[#allocation5 + $0x278] ss:$12 sps:$4 sm:$0xff]   ;;  %vm2581_vm1 = vmmov 0  }
  0x5b   :  { %2047 = vmatpush3.bf16.msra.mxu1 %v2287_v26  ;;  %v2267_v50 = vld [vmem:[#allocation5 + $0x16c] ss:$12 sps:$4 sm:$0xff]   ;;  %v2317_v51 = vld [vmem:[#allocation5 + $0x188] ss:$12 sps:$4 sm:$0xff]   ;;  %v91_v52 = vpack.c.bf16 %v84_v49, %v84_v49  ;;  %v2272_v55 = vld [vmem:[#allocation5 + $0x184] ss:$12 sps:$4 sm:$0xff]  }
  0x5c   :  { %1108 = vmatpush1.bf16.msra.mxu0 %v2236_v9  ;;  %2048 = vmatprep.subr.bf16.mxu1 %v2291_v29  ;;  %v2321_v53 = vld [vmem:[#allocation5 + $0x260] ss:$12 sps:$4 sm:$0xff]   ;;  %v2269_v54 = vld [vmem:[#allocation5 + $0x168] ss:$12 sps:$4 sm:$0xff]   ;;  %v2327_v60 = vld [vmem:[#allocation5 + $0x1b8] ss:$12 sps:$4 sm:$0xff]  }
  0x5d   :  { %1109 = vmatprep.subr.bf16.mxu0 %v2237_v10  ;;  %v2322_v56 = vld [vmem:[#allocation5 + $0x1a0] ss:$12 sps:$4 sm:$0xff]   ;;  %v2275_v59 = vld [vmem:[#allocation5 + $0x19c] ss:$12 sps:$4 sm:$0xff]   ;;  %v2273_v62 = vld [vmem:[#allocation5 + $0x198] ss:$12 sps:$4 sm:$0xff]  }
  0x5e   :  { %v2270_v58 = vld [vmem:[#allocation5 + $0x180] ss:$12 sps:$4 sm:$0xff]   ;;  %v2331_v61 = vld [vmem:[#allocation5 + $0x290] ss:$12 sps:$4 sm:$0xff]   ;;  %v2336_v1 = vld [vmem:[#allocation5 + $0x2a8] ss:$12 sps:$4 sm:$0xff]  }
  0x5f   :  { %2049 = vmatpush3.bf16.msra.mxu1 %v2292_v30  ;;  %v2280_v63 = vld [vmem:[#allocation5 + $0x1b4] ss:$12 sps:$4 sm:$0xff]   ;;  %v2332_v0 = vld [vmem:[#allocation5 + $0x1d0] ss:$12 sps:$4 sm:$0xff]   ;;  %v2285_v3 = vld [vmem:[#allocation5 + $0x1cc] ss:$12 sps:$4 sm:$0xff]  }
  0x60   :  { %1110 = vmatpush1.bf16.msra.mxu0 %v2239_v11  ;;  %2050 = vmatprep.subr.bf16.mxu1 %v2296_v32  ;;  %v2278_v2 = vld [vmem:[#allocation5 + $0x1b0] ss:$12 sps:$4 sm:$0xff]   ;;  %v2337_v4 = vld [vmem:[#allocation5 + $0x1e8] ss:$12 sps:$4 sm:$0xff]   ;;  %v2341_v5 = vld [vmem:[#allocation5 + $0x2c0] ss:$12 sps:$4 sm:$0xff]  }
  0x61   :  { %1111 = vmatprep.subr.bf16.mxu0 %v2240_v12  ;;  %v87_v6 = vld [vmem:[#allocation2 + $0x18] sm:$0xff]  ;;  %v2283_v7 = vld [vmem:[#allocation5 + $0x1c8] ss:$12 sps:$4 sm:$0xff]   ;;  %v2352_v18 = vld [vmem:[#allocation5 + $0x230] ss:$12 sps:$4 sm:$0xff]  }
  0x62   :  { %v94_v8 = vpack.c.bf16 %v87_v6, %v87_v6  ;;  %v2290_v9 = vld [vmem:[#allocation5 + $0x1e4] ss:$12 sps:$4 sm:$0xff]   ;;  %v2342_v10 = vld [vmem:[#allocation5 + $0x200] ss:$12 sps:$4 sm:$0xff]   ;;  %v2295_v13 = vld [vmem:[#allocation5 + $0x1fc] ss:$12 sps:$4 sm:$0xff]  }
  0x63   :  { %2051 = vmatpush3.bf16.msra.mxu1 %v2297_v34  ;;  %v2346_v11 = vld [vmem:[#allocation5 + $0x2d8] ss:$12 sps:$4 sm:$0xff]   ;;  %v2288_v12 = vld [vmem:[#allocation5 + $0x1e0] ss:$12 sps:$4 sm:$0xff]   ;;  %v2298_v21 = vld [vmem:[#allocation5 + $0x210] ss:$12 sps:$4 sm:$0xff]  }
  0x64   :  { %1112 = vmatpush1.bf16.msra.mxu0 %v2242_v15  ;;  %2052 = vmatprep.subr.bf16.mxu1 %v2301_v35  ;;  %v2347_v14 = vld [vmem:[#allocation5 + $0x218] ss:$12 sps:$4 sm:$0xff]   ;;  %v2351_v15 = vld [vmem:[#allocation5 + $0x2f0] ss:$12 sps:$4 sm:$0xff]   ;;  %v2300_v17 = vld [vmem:[#allocation5 + $0x214] ss:$12 sps:$4 sm:$0xff]  }
  0x65   :  { %1113 = vmatprep.subr.bf16.mxu0 %v2243_v16  ;;  %v2293_v16 = vld [vmem:[#allocation5 + $0x1f8] ss:$12 sps:$4 sm:$0xff]   ;;  %v2361_v25 = vld [vmem:[#allocation5 + $0x3e0] ss:$12 sps:$4 sm:$0xff]   ;;  %v2303_v26 = vld [vmem:[#allocation5 + $0x228] ss:$12 sps:$4 sm:$0xff]  }
  0x66   :  { %v2305_v22 = vld [vmem:[#allocation5 + $0x22c] ss:$12 sps:$4 sm:$0xff]   ;;  %v2320_v35 = vld [vmem:[#allocation5 + $0x274] ss:$12 sps:$4 sm:$0xff]   ;;  %v2335_v49 = vld [vmem:[#allocation5 + $0x2bc] ss:$12 sps:$4 sm:$0xff]  }
  0x67   :  { %2053 = vmatpush3.bf16.msra.mxu1 %v2302_v38  ;;  %v2366_v29 = vld [vmem:[#allocation5 + $0x3f8] ss:$12 sps:$4 sm:$0xff]   ;;  %v2308_v30 = vld [vmem:[#allocation5 + $0x240] ss:$12 sps:$4 sm:$0xff]   ;;  %v2318_v38 = vld [vmem:[#allocation5 + $0x270] ss:$12 sps:$4 sm:$0xff]  }
  0x68   :  { %1114 = vmatpush1.bf16.msra.mxu0 %v2245_v19  ;;  %2054 = vmatprep.subr.bf16.mxu1 %v2306_v39  ;;  %v2356_v19 = vld [vmem:[#allocation5 + $0x3c8] ss:$12 sps:$4 sm:$0xff]   ;;  %v2367_v32 = vld [vmem:[#allocation5 + $0x338] ss:$12 sps:$4 sm:$0xff]  }
  0x69   :  { %1115 = vmatprep.subr.bf16.mxu0 %v2246_v20  ;;  %v86_v20 = vld [vmem:[#allocation2 + $0x10] sm:$0xff] }
  0x6a   :  { %v2313_v34 = vld [vmem:[#allocation5 + $0x258] ss:$12 sps:$4 sm:$0xff]  }
  0x6b   :  { %2055 = vmatpush3.bf16.msra.mxu1 %v2307_v42  ;;  %v2325_v39 = vld [vmem:[#allocation5 + $0x28c] ss:$12 sps:$4 sm:$0xff]   ;;  %v89_v42 = vld [vmem:[#allocation2 + $0x28] sm:$0xff] }
  0x6c   :  { %1116 = vmatpush1.bf16.msra.mxu0 %v2248_v23  ;;  %2056 = vmatprep.subr.bf16.mxu1 %v2311_v43  ;;  %v2357_v23 = vld [vmem:[#allocation5 + $0x308] ss:$12 sps:$4 sm:$0xff]   ;;  %v2365_v6 = vld [vmem:[#allocation5 + $0x34c] ss:$12 sps:$4 sm:$0xff]  }
  0x6d   :  { %1117 = vmatprep.subr.bf16.mxu0 %v2249_v24  ;;  %v2677_v24 = vpack.c.bf16 %v86_v20, %v86_v20  ;;  %v2323_v43 = vld [vmem:[#allocation5 + $0x288] ss:$12 sps:$4 sm:$0xff]  }
  0x6e   :  { %v2398_v20 = vld [vmem:[#allocation5 + $0x3f4] ss:$12 sps:$4 sm:$0xff]  }
  0x6f   :  { %2057 = vmatpush3.bf16.msra.mxu1 %v2312_v46  ;;  %v2382_v46 = vld [vmem:[#allocation5 + $0x380] ss:$12 sps:$4 sm:$0xff]  }
  0x70   :  { %1118 = vmatpush1.bf16.msra.mxu0 %v2251_v27  ;;  %2064 = vmatprep.subr.bf16.mxu1 %v2316_v47  ;;  %v2310_v27 = vld [vmem:[#allocation5 + $0x244] ss:$12 sps:$4 sm:$0xff]  }
  0x71   :  { %1119 = vmatprep.subr.bf16.mxu0 %v2252_v28  ;;  %v2362_v28 = vld [vmem:[#allocation5 + $0x320] ss:$12 sps:$4 sm:$0xff]   ;;  %v2386_v47 = vld [vmem:[#allocation5 + $0x458] ss:$12 sps:$4 sm:$0xff]  }
  0x72   :  { %1296 = vmatmul.mubr.bf16.vlgmr.msra.gmra.mrb[0].mxu1 %v91_v52 }
  0x73   :  { %2065 = vmatpush3.bf16.msra.mxu1 %v2317_v51  ;;  %1335 = vmatprep.mubr.bf16.mxu1 %v94_v8  ;;  %v2391_v51 = vld [vmem:[#allocation5 + $0x470] ss:$12 sps:$4 sm:$0xff]  }
  0x74   :  { %1120 = vmatpush1.bf16.msra.mxu0 %v2254_v31  ;;  %2066 = vmatprep.subr.bf16.mxu1 %v2321_v53  ;;  %v2315_v31 = vld [vmem:[#allocation5 + $0x25c] ss:$12 sps:$4 sm:$0xff]   ;;  %v2340_v53 = vld [vmem:[#allocation5 + $0x2d4] ss:$12 sps:$4 sm:$0xff]  }
  0x75   :  { %1121 = vmatprep.subr.bf16.mxu0 %v2255_v33  ;;  %v2371_v33 = vld [vmem:[#allocation5 + $0x410] ss:$12 sps:$4 sm:$0xff]  }
  0x77   :  { %2067 = vmatpush3.bf16.msra.mxu1 %v2322_v56  ;;  %v2338_v56 = vld [vmem:[#allocation5 + $0x2d0] ss:$12 sps:$4 sm:$0xff]  }
  0x78   :  { %1122 = vmatpush1.bf16.msra.mxu0 %v2257_v36  ;;  %2068 = vmatprep.subr.bf16.mxu1 %v2326_v57  ;;  %v2372_v36 = vld [vmem:[#allocation5 + $0x350] ss:$12 sps:$4 sm:$0xff]   ;;  %v2345_v57 = vld [vmem:[#allocation5 + $0x2ec] ss:$12 sps:$4 sm:$0xff]  }
  0x79   :  { %1123 = vmatprep.subr.bf16.mxu0 %v2258_v37  ;;  %v2376_v37 = vld [vmem:[#allocation5 + $0x428] ss:$12 sps:$4 sm:$0xff]  }
  0x7b   :  { %2069 = vmatpush3.bf16.msra.mxu1 %v2327_v60  ;;  %v2343_v60 = vld [vmem:[#allocation5 + $0x2e8] ss:$12 sps:$4 sm:$0xff]  }
  0x7c   :  { %1124 = vmatpush1.bf16.msra.mxu0 %v2260_v40  ;;  %2070 = vmatprep.subr.bf16.mxu1 %v2331_v61  ;;  %v2377_v40 = vld [vmem:[#allocation5 + $0x368] ss:$12 sps:$4 sm:$0xff]   ;;  %v2580_v61 = vmov 0.0  }
  0x7d   :  { %1125 = vmatprep.subr.bf16.mxu0 %v2261_v41  ;;  %v2381_v41 = vld [vmem:[#allocation5 + $0x440] ss:$12 sps:$4 sm:$0xff]  }
  0x7f   :  { %2071 = vmatpush3.bf16.msra.mxu1 %v2332_v0  ;;  %v2348_v0 = vld [vmem:[#allocation5 + $0x300] ss:$12 sps:$4 sm:$0xff]  }
  0x80   :  { %1126 = vmatpush1.bf16.msra.mxu0 %v2263_v44  ;;  %2072 = vmatprep.subr.bf16.mxu1 %v2336_v1  ;;  %v96_v44 = vpack.c.bf16 %v89_v42, %v89_v42  ;;  %v2355_v1 = vld [vmem:[#allocation5 + $0x31c] ss:$12 sps:$4 sm:$0xff]   ;;  %v2425_v42 = vld [vmem:[#allocation7 + $0x18] sm:$0xff]  }
  0x81   :  { %1127 = vmatprep.subr.bf16.mxu0 %v2264_v45  ;;  %v2330_v45 = vld [vmem:[#allocation5 + $0x2a4] ss:$12 sps:$4 sm:$0xff]  }
  0x83   :  { %2073 = vmatpush3.bf16.msra.mxu1 %v2337_v4  ;;  %v2360_v4 = vld [vmem:[#allocation5 + $0x334] ss:$12 sps:$4 sm:$0xff]  }
  0x84   :  { %1128 = vmatpush1.bf16.msra.mxu0 %v2266_v48  ;;  %2074 = vmatprep.subr.bf16.mxu1 %v2341_v5  ;;  %v2328_v48 = vld [vmem:[#allocation5 + $0x2a0] ss:$12 sps:$4 sm:$0xff]   ;;  %v2358_v5 = vld [vmem:[#allocation5 + $0x330] ss:$12 sps:$4 sm:$0xff]  }
  0x85   :  { %1129 = vmatprep.subr.bf16.mxu0 %v2267_v50  ;;  %v2387_v50 = vld [vmem:[#allocation5 + $0x398] ss:$12 sps:$4 sm:$0xff]  }
  0x87   :  { %2075 = vmatpush3.bf16.msra.mxu1 %v2342_v10  ;;  %v2375_v10 = vld [vmem:[#allocation5 + $0x37c] ss:$12 sps:$4 sm:$0xff]  }
  0x88   :  { %1130 = vmatpush1.bf16.msra.mxu0 %v2269_v54  ;;  %2076 = vmatprep.subr.bf16.mxu1 %v2346_v11  ;;  %v2392_v54 = vld [vmem:[#allocation5 + $0x3b0] ss:$12 sps:$4 sm:$0xff]   ;;  %v2373_v11 = vld [vmem:[#allocation5 + $0x378] ss:$12 sps:$4 sm:$0xff]  }
  0x89   :  { %1140 = vmatprep.subr.bf16.mxu0 %v2272_v55  ;;  %v88_v55 = vld [vmem:[#allocation2 + $0x20] sm:$0xff] }
  0x8b   :  { %1132 = vmatmul.mubr.bf16.vlgmr.msra.gmra.mrb[0].mxu0 %v91_v52  ;;  %2077 = vmatpush3.bf16.msra.mxu1 %v2347_v14  ;;  %v2333_v52 = vld [vmem:[#allocation5 + $0x2b8] ss:$12 sps:$4 sm:$0xff]  }
  0x8c   :  { %1141 = vmatpush1.bf16.msra.mxu0 %v2270_v58  ;;  %1172 = vmatprep.mubr.bf16.mxu0 %v94_v8  ;;  %v2399_v58 = vld [vmem:[#allocation5 + $0x488] ss:$12 sps:$4 sm:$0xff]   ;;  %v2370_v8 = vld [vmem:[#allocation5 + $0x364] ss:$12 sps:$4 sm:$0xff]   ;;  %v2385_v14 = vld [vmem:[#allocation5 + $0x3ac] ss:$12 sps:$4 sm:$0xff]  }
  0x8d   :  { %1142 = vmatprep.subr.bf16.mxu0 %v2275_v59  ;;  %2078 = vmatprep.subr.bf16.mxu1 %v2351_v15  ;;  %v2680_v59 = vpack.c.bf16 %v88_v55, %v88_v55  ;;  %v2383_v15 = vld [vmem:[#allocation5 + $0x3a8] ss:$12 sps:$4 sm:$0xff]  }
  0x8f   :  { %2079 = vmatpush3.bf16.msra.mxu1 %v2352_v18  ;;  %v2395_v18 = vld [vmem:[#allocation5 + $0x3dc] ss:$12 sps:$4 sm:$0xff]  }
  0x90   :  { %1143 = vmatpush1.bf16.msra.mxu0 %v2273_v62  ;;  %2086 = vmatprep.subr.bf16.mxu1 %v2356_v19  ;;  %v2350_v62 = vld [vmem:[#allocation5 + $0x304] ss:$12 sps:$4 sm:$0xff]  }
  0x91   :  { %1144 = vmatprep.subr.bf16.mxu0 %v2280_v63  ;;  %v90_v63 = vld [vmem:[#allocation2 + $0x30] sm:$0xff] }
  0x92   :  { %1336 = vmatmul.mubr.bf16.vlgmr.msra.gmra.mrb[4].mxu1 %v2677_v24  ;;  %v2393_v19 = vld [vmem:[#allocation5 + $0x3d8] ss:$12 sps:$4 sm:$0xff]  }
  0x93   :  { %2087 = vmatpush3.bf16.msra.mxu1 %v2357_v23  ;;  %1375 = vmatprep.mubr.bf16.mxu1 %v96_v44  ;;  %v2400_v23 = vld [vmem:[#allocation5 + $0x408] ss:$12 sps:$4 sm:$0xff]  }
  0x94   :  { %1145 = vmatpush1.bf16.msra.mxu0 %v2278_v2  ;;  %2088 = vmatprep.subr.bf16.mxu1 %v2361_v25  ;;  %v2686_v2 = vpack.c.bf16 %v90_v63, %v90_v63  ;;  %v2403_v25 = vld [vmem:[#allocation5 + $0x420] ss:$12 sps:$4 sm:$0xff]  }
  0x95   :  { %1146 = vmatprep.subr.bf16.mxu0 %v2285_v3  ;;  %v2353_v3 = vld [vmem:[#allocation5 + $0x318] ss:$12 sps:$4 sm:$0xff]  }
  0x97   :  { %2089 = vmatpush3.bf16.msra.mxu1 %v2362_v28  ;;  %v2411_v28 = vld [vmem:[#allocation5 + $0x454] ss:$12 sps:$4 sm:$0xff]  }
  0x98   :  { %1147 = vmatpush1.bf16.msra.mxu0 %v2283_v7  ;;  %2090 = vmatprep.subr.bf16.mxu1 %v2366_v29  ;;  %v2363_v7 = vld [vmem:[#allocation5 + $0x348] ss:$12 sps:$4 sm:$0xff]   ;;  %v2409_v29 = vld [vmem:[#allocation5 + $0x450] ss:$12 sps:$4 sm:$0xff]  }
  0x99   :  { %1148 = vmatprep.subr.bf16.mxu0 %v2290_v9  ;;  %v2368_v9 = vld [vmem:[#allocation5 + $0x360] ss:$12 sps:$4 sm:$0xff]  }
  0x9b   :  { %2091 = vmatpush3.bf16.msra.mxu1 %v2367_v32  ;;  %v2417_v32 = vld [vmem:[#allocation5 + $0x484] ss:$12 sps:$4 sm:$0xff]  }
  0x9c   :  { %1149 = vmatpush1.bf16.msra.mxu0 %v2288_v12  ;;  %2092 = vmatprep.subr.bf16.mxu1 %v2371_v33  ;;  %v2380_v12 = vld [vmem:[#allocation5 + $0x394] ss:$12 sps:$4 sm:$0xff]  }
  0x9d   :  { %1150 = vmatprep.subr.bf16.mxu0 %v2295_v13  ;;  %v2378_v13 = vld [vmem:[#allocation5 + $0x390] ss:$12 sps:$4 sm:$0xff]   ;;  %v2415_v33 = vld [vmem:[#allocation5 + $0x480] ss:$12 sps:$4 sm:$0xff]  }
  0x9f   :  { %2093 = vmatpush3.bf16.msra.mxu1 %v2372_v36  ;;  %v2419_v36 = vld [vmem:[#allocation7] sm:$0xff]  }
  0xa0   :  { %1151 = vmatpush1.bf16.msra.mxu0 %v2293_v16  ;;  %2094 = vmatprep.subr.bf16.mxu1 %v2376_v37  ;;  %v2390_v16 = vld [vmem:[#allocation5 + $0x3c4] ss:$12 sps:$4 sm:$0xff]  }
  0xa1   :  { %1152 = vmatprep.subr.bf16.mxu0 %v2300_v17  ;;  %v2388_v17 = vld [vmem:[#allocation5 + $0x3c0] ss:$12 sps:$4 sm:$0xff]  }
  0xa2   :  { %v2420_v37 = vld [vmem:[#allocation7 + $0x48] sm:$0xff]  }
  0xa3   :  { %2095 = vmatpush3.bf16.msra.mxu1 %v2377_v40  ;;  %v2423_v40 = vld [vmem:[#allocation7 + $0x10] sm:$0xff]  }
  0xa4   :  { %1153 = vmatpush1.bf16.msra.mxu0 %v2298_v21  ;;  %2096 = vmatprep.subr.bf16.mxu1 %v2381_v41  ;;  %v2396_v21 = vld [vmem:[#allocation5 + $0x3f0] ss:$12 sps:$4 sm:$0xff]  }
  0xa5   :  { %1154 = vmatprep.subr.bf16.mxu0 %v2305_v22  ;;  %v2402_v22 = vld [vmem:[#allocation5 + $0x40c] ss:$12 sps:$4 sm:$0xff]   ;;  %v2424_v41 = vld [vmem:[#allocation7 + $0x58] sm:$0xff]  }
  0xa7   :  { %2097 = vmatpush3.bf16.msra.mxu1 %v2382_v46  ;;  %v2429_v46 = vld [vmem:[#allocation7 + $0x28] sm:$0xff]  }
  0xa8   :  { %1155 = vmatpush1.bf16.msra.mxu0 %v2303_v26  ;;  %2098 = vmatprep.subr.bf16.mxu1 %v2386_v47  ;;  %v2408_v26 = vld [vmem:[#allocation5 + $0x43c] ss:$12 sps:$4 sm:$0xff]  }
  0xa9   :  { %1156 = vmatprep.subr.bf16.mxu0 %v2310_v27  ;;  %v2406_v27 = vld [vmem:[#allocation5 + $0x438] ss:$12 sps:$4 sm:$0xff]  }
  0xab   :  { %2099 = vmatpush3.bf16.msra.mxu1 %v2387_v50 }
  0xac   :  { %1157 = vmatpush1.bf16.msra.mxu0 %v2308_v30  ;;  %2100 = vmatprep.subr.bf16.mxu1 %v2391_v51  ;;  %v2414_v30 = vld [vmem:[#allocation5 + $0x46c] ss:$12 sps:$4 sm:$0xff]  }
  0xad   :  { %1158 = vmatprep.subr.bf16.mxu0 %v2315_v31  ;;  %v2412_v31 = vld [vmem:[#allocation5 + $0x468] ss:$12 sps:$4 sm:$0xff]  }
  0xaf   :  { %2101 = vmatpush3.bf16.msra.mxu1 %v2392_v54  ;;  %v2431_v54 = vld [vmem:[#allocation7 + $0x30] sm:$0xff]  }
  0xb0   :  { %1159 = vmatpush1.bf16.msra.mxu0 %v2313_v34  ;;  %2150 = vmatprep.subr.bf16.mxu1 %v2580_v61  ;;  %v2582_v34 = vmov 0  }
  0xb1   :  { %1160 = vmatprep.subr.bf16.mxu0 %v2320_v35  ;;  %v2418_v35 = vld [vmem:[#allocation7 + $0x40] sm:$0xff]  }
  0xb2   :  { %1376 = vmatmul.mubr.bf16.vlgmr.msra.gmra.mrb[8].mxu1 %v2680_v59 }
  0xb3   :  { %2151 = vmatpush3.bf16.msra.mxu1 %v2399_v58  ;;  %2152 = vmatprep.mubr.msk.bf16.mxu1 %vm2581_vm1, %v2580_v61 }
  0xb4   :  { %1161 = vmatpush1.bf16.msra.mxu0 %v2318_v38  ;;  %2110 = vmatprep.subr.bf16.mxu1 %v2418_v35  ;;  %v2421_v38 = vld [vmem:[#allocation7 + $0x8] sm:$0xff]  }
  0xb5   :  { %1162 = vmatprep.subr.bf16.mxu0 %v2325_v39  ;;  %v2422_v39 = vld [vmem:[#allocation7 + $0x50] sm:$0xff]   ;;  %v2439_v35 = vld [vmem:[#allocation7 + $0xa8] sm:$0xff]  }
  0xb8   :  { %1163 = vmatpush1.bf16.msra.mxu0 %v2323_v43  ;;  %v2426_v43 = vld [vmem:[#allocation7 + $0x60] sm:$0xff]  }
  0xb9   :  { %1164 = vmatprep.subr.bf16.mxu0 %v2330_v45  ;;  %v2428_v45 = vld [vmem:[#allocation7 + $0x68] sm:$0xff]  }
  0xba   :  { %2153 = vmatmul.mubr.msk.bf16.vlgmr.msra.gmra.mrb[12].mxu1 %vm1095_vm0, %v2686_v2 }
  0xbb   :  { %2111 = vmatpush3.bf16.msra.mxu1 %v2419_v36  ;;  %v2440_v36 = vld [vmem:[#allocation7 + $0xb0] sm:$0xff]  }
  0xbc   :  { %1165 = vmatpush1.bf16.msra.mxu0 %v2328_v48  ;;  %2112 = vmatprep.subr.bf16.mxu1 %v2420_v37  ;;  %v2441_v37 = vld [vmem:[#allocation7 + $0xb8] sm:$0xff]  }
  0xbd   :  { %1166 = vmatprep.subr.bf16.mxu0 %v2335_v49 }
  0xbf   :  { %2113 = vmatpush3.bf16.msra.mxu1 %v2421_v38 }
  0xc0   :  { %1167 = vmatpush1.bf16.msra.mxu0 %v2333_v52  ;;  %2114 = vmatprep.subr.bf16.mxu1 %v2422_v39  ;;  %v296_v52 = vlaneseq }
  0xc1   :  { %1168 = vmatprep.subr.bf16.mxu0 %v2340_v53  ;;  %v2430_v53 = vld [vmem:[#allocation7 + $0x70] sm:$0xff]  }
  0xc2   :  { %v297_v55 = vshrl.u32 %v296_v52, 7 }
  0xc3   :  { %2115 = vmatpush3.bf16.msra.mxu1 %v2423_v40  ;;  %v2442_v40 = vld [vmem:[#allocation8] sm:$0xff]  }
  0xc4   :  { %1169 = vmatpush1.bf16.msra.mxu0 %v2338_v56  ;;  %2116 = vmatprep.subr.bf16.mxu1 %v2424_v41  ;;  %v2432_v56 = vld [vmem:[#allocation7 + $0x78] sm:$0xff]   ;;  %v306_v58 = vsub.s32 2, %v297_v55  ;;  %v2443_v41 = vld [vmem:[#allocation8 + $0x8] sm:$0xff]  }
  0xc5   :  { %1170 = vmatprep.subr.bf16.mxu0 %v2345_v57  ;;  %v2433_v57 = vld [vmem:[#allocation7 + $0x38] sm:$0xff]  }
  0xc7   :  { %2117 = vmatpush3.bf16.msra.mxu1 %v2425_v42  ;;  %v2444_v42 = vld [vmem:[#allocation8 + $0x10] sm:$0xff]  }
  0xc8   :  { %1171 = vmatpush1.bf16.msra.mxu0 %v2343_v60  ;;  %2118 = vmatprep.subr.bf16.mxu1 %v2426_v43  ;;  %v2445_v43 = vld [vmem:[#allocation8 + $0x18] sm:$0xff]  }
  0xc9   :  { %1181 = vmatprep.subr.bf16.mxu0 %v2350_v62 }
  0xcb   :  { %1173 = vmatmul.mubr.bf16.vlgmr.msra.gmra.mrb[0].mxu0 %v2677_v24  ;;  %v2405_v24 = vld [vmem:[#allocation5 + $0x424] ss:$12 sps:$4 sm:$0xff]  }
  0xcc   :  { %1182 = vmatpush1.bf16.msra.mxu0 %v2348_v0  ;;  %1213 = vmatprep.mubr.bf16.mxu0 %v96_v44  ;;  %v2427_v44 = vld [vmem:[#allocation7 + $0x20] sm:$0xff]  }
  0xcd   :  { %1183 = vmatprep.subr.bf16.mxu0 %v2355_v1  ;;  %2119 = vmatpush3.bf16.msra.mxu1 %v2427_v44  ;;  %v2446_v44 = vld [vmem:[#allocation8 + $0x20] sm:$0xff]  }
  0xce   :  { %2120 = vmatprep.subr.bf16.mxu1 %v2428_v45  ;;  %v2447_v45 = vld [vmem:[#allocation8 + $0x28] sm:$0xff]  }
  0xd0   :  { %1184 = vmatpush1.bf16.msra.mxu0 %v2353_v3 }
  0xd1   :  { %1185 = vmatprep.subr.bf16.mxu0 %v2360_v4  ;;  %2121 = vmatpush3.bf16.msra.mxu1 %v2429_v46  ;;  %v2448_v46 = vld [vmem:[#allocation8 + $0x30] sm:$0xff]  }
  0xd2   :  { %2122 = vmatprep.subr.bf16.mxu1 %v2430_v53  ;;  %v2007_v53 = vld [vmem:[%s2743_s5] ss:$0 sm:$0xff]  ;;  %s2583_s5 = smov [#allocation10]  }
  0xd4   :  { %1186 = vmatpush1.bf16.msra.mxu0 %v2358_v5 }
  0xd5   :  { %1187 = vmatprep.subr.bf16.mxu0 %v2365_v6  ;;  %2123 = vmatpush3.bf16.msra.mxu1 %v2431_v54 }
  0xd6   :  { %2124 = vmatprep.subr.bf16.mxu1 %v2432_v56 }
  0xd8   :  { %1188 = vmatpush1.bf16.msra.mxu0 %v2363_v7 }
  0xd9   :  { %1189 = vmatprep.subr.bf16.mxu0 %v2370_v8  ;;  %2125 = vmatpush3.bf16.msra.mxu1 %v2433_v57 }
  0xda   :  { %2156 = vmatprep.subr.bf16.mxu1 %v2580_v61 }
  0xdc   :  { %1190 = vmatpush1.bf16.msra.mxu0 %v2368_v9 }
  0xdd   :  { %1191 = vmatprep.subr.bf16.mxu0 %v2375_v10 }
  0xe0   :  { %1192 = vmatpush1.bf16.msra.mxu0 %v2373_v11 }
  0xe1   :  { %1193 = vmatprep.subr.bf16.mxu0 %v2380_v12 }
  0xe4   :  { %1194 = vmatpush1.bf16.msra.mxu0 %v2378_v13 }
  0xe5   :  { %1195 = vmatprep.subr.bf16.mxu0 %v2385_v14 }
  0xe8   :  { %1196 = vmatpush1.bf16.msra.mxu0 %v2383_v15 }
  0xe9   :  { %1197 = vmatprep.subr.bf16.mxu0 %v2390_v16  ;;  %v298_v16 = vsub.s32 0, %v297_v55 }
  0xec   :  { %1198 = vmatpush1.bf16.msra.mxu0 %v2388_v17  ;;  %v302_v17 = vsub.s32 1, %v297_v55 }
  0xed   :  { %1199 = vmatprep.subr.bf16.mxu0 %v2395_v18 }
  0xf0   :  { %1200 = vmatpush1.bf16.msra.mxu0 %v2393_v19 }
  0xf1   :  { %1201 = vmatprep.subr.bf16.mxu0 %v2398_v20 }
  0xf4   :  { %1202 = vmatpush1.bf16.msra.mxu0 %v2396_v21 }
  0xf5   :  { %1203 = vmatprep.subr.bf16.mxu0 %v2402_v22 }
  0xf8   :  { %1204 = vmatpush1.bf16.msra.mxu0 %v2400_v23 }
  0xf9   :  { %1205 = vmatprep.subr.bf16.mxu0 %v2405_v24 }
  0xfc   :  { %1206 = vmatpush1.bf16.msra.mxu0 %v2403_v25 }
  0xfd   :  { %1207 = vmatprep.subr.bf16.mxu0 %v2408_v26 }
 0x100   :  { %1208 = vmatpush1.bf16.msra.mxu0 %v2406_v27 }
 0x101   :  { %1209 = vmatprep.subr.bf16.mxu0 %v2411_v28 }
 0x104   :  { %1210 = vmatpush1.bf16.msra.mxu0 %v2409_v29  ;;  %v2434_v29 = vld [vmem:[#allocation7 + $0x80] sm:$0xff]  }
 0x105   :  { %1211 = vmatprep.subr.bf16.mxu0 %v2414_v30 }
 0x108   :  { %1212 = vmatpush1.bf16.msra.mxu0 %v2412_v31  ;;  %v2435_v31 = vld [vmem:[#allocation7 + $0x88] sm:$0xff]  }
 0x109   :  { %1222 = vmatprep.subr.bf16.mxu0 %v2417_v32  ;;  %v2436_v32 = vld [vmem:[#allocation7 + $0x90] sm:$0xff]  }
 0x10b   :  { %1214 = vmatmul.mubr.bf16.vlgmr.msra.gmra.mrb[0].mxu0 %v2680_v59  ;;  %v294_v59 = vld [vmem:[%s2741_s3] sm:$0x7] }
 0x10c   :  { %1223 = vmatpush1.bf16.msra.mxu0 %v2415_v33  ;;  %1254 = vmatprep.mubr.bf16.mxu0 %v2582_v34  ;;  %v307_v60 = vrot.slane %v294_v59, %v306_v58  ;;  %v299_v18 = vrot.slane %v294_v59, %v298_v16  ;;  %v303_v19 = vrot.slane %v294_v59, %v302_v17  ;;  %v2437_v33 = vld [vmem:[#allocation7 + $0x98] sm:$0xff]   ;;  %v2438_v34 = vld [vmem:[#allocation7 + $0xa0] sm:$0xff]  }
 0x117   :  { %2005 = vmatmul.mubr.msk.bf16.vlgmr.msra.gmra.mrb[0].mxu0 %vm1095_vm0, %v2686_v2 }
 0x145   :  { %v2058_v47 = vpop.f32.mrb[0].mxu1 }
 0x146   :  { %v2059_v48 = vpop.f32.mrb[1].mxu1 }
 0x147   :  { %v2060_v49 = vadd.f32 %v2059_v48, %v2058_v47  ;;  %v2061_v50 = vpop.f32.mrb[2].mxu1  ;;  %v2449_v47 = vld [vmem:[#allocation8 + $0x38] sm:$0xff]  }
 0x148   :  { %v2062_v51 = vpop.f32.mrb[3].mxu1 }
 0x149   :  { %v1298_v62 = vadd.f32 %v2060_v49, %v307_v60 }
 0x165   :  { %v2080_v63 = vpop.f32.mrb[4].mxu1 }
 0x166   :  { %v2081_v0 = vpop.f32.mrb[5].mxu1 }
 0x167   :  { %v2082_v1 = vadd.f32 %v2081_v0, %v2080_v63  ;;  %v2083_v2 = vpop.f32.mrb[6].mxu1 }
 0x168   :  { %v2084_v3 = vpop.f32.mrb[7].mxu1 }
 0x169   :  { %v1338_v4 = vadd.f32 %v2082_v1, %v1298_v62  ;;  %v2041_v3 = vld [vmem:[%s2739_s1] ss:$0 sm:$0xff] }
 0x185   :  { %v2102_v5 = vpop.f32.mrb[8].mxu1 }
 0x186   :  { %v2103_v6 = vpop.f32.mrb[9].mxu1 }
 0x187   :  { %v2104_v7 = vadd.f32 %v2103_v6, %v2102_v5  ;;  %v2105_v8 = vpop.f32.mrb[10].mxu1 }
 0x188   :  { %v2106_v9 = vpop.f32.mrb[11].mxu1 }
 0x189   :  { %v1378_v10 = vadd.f32 %v2104_v7, %v1338_v4 }
 0x18d   :  { %v1417_v11 = vpop.f32.mrb[12].mxu1 }
 0x18e   :  { %v1418_v12 = vadd.f32 %v1417_v11, %v1378_v10  ;;  %v2154_v13 = vpop.f32.mrb[13].mxu1 }
 0x18f   :  { %v1420_v14 = vpop.f32.mrb[14].mxu1 }
 0x190   :  { %v2155_v15 = vpop.f32.mrb[15].mxu1  ;;  %v1425_v38 = vmax.f32 %v1418_v12, 0.0 }
 0x192   :  { %v1428_v39 = vpack.c.bf16 %v1425_v38, %v1425_v38 }
 0x1ea   :  { %v1256_v20 = vpop.f32.mrb[0].mxu0 }
 0x1eb   :  { %v2196_v21 = vadd.f32 %v1256_v20, %v299_v18  ;;  %v1258_v22 = vpop.f32.mrb[1].mxu0 }
 0x1ec   :  { %v2197_v23 = vadd.f32 %v1258_v22, %v303_v19  ;;  %v1260_v24 = vpop.f32.mrb[2].mxu0 }
 0x1ed   :  { %v1423_v25 = vmax.f32 %v2196_v21, 0.0  ;;  %v1261_v26 = vpop.f32.mrb[3].mxu0 }
 0x1ee   :  { %v1424_v27 = vmax.f32 %v2197_v23, 0.0 }
 0x1ef   :  { %v1426_v30 = vpack.c.bf16 %v1423_v25, %v1423_v25 }
 0x1f0   :  { %v1427_v28 = vpack.c.bf16 %v1424_v27, %v1424_v27 }
 0x1f2   :  { %1660 = vmatprep.mubr.bf16.mxu1 %v1427_v28 }
 0x1f3   :  { %1661 = vmatmul.mubr.bf16.vlgmr.msra.gmra.mrb[16].mxu1 %v1426_v30 }
 0x1f4   :  { %2157 = vmatpush3.bf16.msra.mxu1 %v2434_v29  ;;  %2172 = vmatprep.mubr.msk.bf16.mxu1 %vm2581_vm1, %v2580_v61 }
 0x1f5   :  { %2158 = vmatprep.subr.bf16.mxu1 %v2580_v61 }
 0x1f8   :  { %2159 = vmatpush3.bf16.msra.mxu1 %v2435_v31 }
 0x1f9   :  { %2160 = vmatprep.subr.bf16.mxu1 %v2580_v61 }
 0x1fc   :  { %2161 = vmatpush3.bf16.msra.mxu1 %v2436_v32 }
 0x1fd   :  { %2162 = vmatprep.subr.bf16.mxu1 %v2580_v61 }
 0x200   :  { %2163 = vmatpush3.bf16.msra.mxu1 %v2437_v33 }
 0x201   :  { %2164 = vmatprep.subr.bf16.mxu1 %v2580_v61 }
 0x204   :  { %2165 = vmatpush3.bf16.msra.mxu1 %v2438_v34 }
 0x205   :  { %2166 = vmatprep.subr.bf16.mxu1 %v2580_v61 }
 0x208   :  { %2167 = vmatpush3.bf16.msra.mxu1 %v2439_v35 }
 0x209   :  { %2168 = vmatprep.subr.bf16.mxu1 %v2580_v61 }
 0x20c   :  { %2169 = vmatpush3.bf16.msra.mxu1 %v2440_v36 }
 0x20d   :  { %2170 = vmatprep.subr.bf16.mxu1 %v2580_v61 }
 0x210   :  { %2171 = vmatpush3.bf16.msra.mxu1 %v2441_v37 }
 0x211   :  { %2176 = vmatprep.subr.bf16.mxu1 %v2580_v61 }
 0x213   :  { %2173 = vmatmul.mubr.bf16.vlgmr.msra.gmra.mrb[20].mxu1 %v1428_v39 }
 0x214   :  { %2192 = vmatprep.mubr.msk.bf16.mxu1 %vm2581_vm1, %v2580_v61  ;;  %2177 = vmatpush3.bf16.msra.mxu1 %v2442_v40 }
 0x215   :  { %2178 = vmatprep.subr.bf16.mxu1 %v2580_v61 }
 0x218   :  { %2179 = vmatpush3.bf16.msra.mxu1 %v2443_v41 }
 0x219   :  { %2180 = vmatprep.subr.bf16.mxu1 %v2580_v61 }
 0x21c   :  { %2181 = vmatpush3.bf16.msra.mxu1 %v2444_v42 }
 0x21d   :  { %2182 = vmatprep.subr.bf16.mxu1 %v2580_v61 }
 0x220   :  { %2183 = vmatpush3.bf16.msra.mxu1 %v2445_v43 }
 0x221   :  { %2184 = vmatprep.subr.bf16.mxu1 %v2580_v61 }
 0x224   :  { %2185 = vmatpush3.bf16.msra.mxu1 %v2446_v44 }
 0x225   :  { %2186 = vmatprep.subr.bf16.mxu1 %v2580_v61 }
 0x228   :  { %2187 = vmatpush3.bf16.msra.mxu1 %v2447_v45 }
 0x229   :  { %2188 = vmatprep.subr.bf16.mxu1 %v2580_v61 }
 0x22c   :  { %2189 = vmatpush3.bf16.msra.mxu1 %v2448_v46 }
 0x22d   :  { %2190 = vmatprep.subr.bf16.mxu1 %v2580_v61  ;;  %v2032_v61 = vld [vmem:[%s2745_s7] ss:$0 sm:$0xff]  ;;  %s1847_s7 = sshll.u32 %s2583_s5, 4  ;;  %s1848_s7 = int_to_ptr.vmem [resolvable:$true] %s1847_s7 }
 0x22e   :  { %s2542_s1 = scalar_lea.vmem %s1848_s7, 128  ;;  %p2547_p5 = scmp.lt.s32.totalorder %s1848_s7, %s1848_s7 }
 0x22f   :  { %p2543_p4 = scmp.ne.s32.totalorder %s1848_s7, %s2542_s1  ;;  %p2548_p6 = scmp.lt.s32.totalorder %s2542_s1, %s2542_s1 }
 0x230   :  { %2191 = vmatpush3.bf16.msra.mxu1 %v2449_v47 }
 0x231   :  { %p2549_p7 = por %p2548_p6, %p2547_p5 }
 0x233   :  { %p2550_p8 = pnand %p2549_p7, %p2543_p4 }
 0x2c6   :  { %v2126_v48 = vpop.f32.mrb[16].mxu1 }
 0x2c7   :  { %v2127_v49 = vpop.f32.mrb[17].mxu1 }
 0x2c8   :  { %v2128_v50 = vadd.f32 %v2127_v49, %v2126_v48  ;;  %v2129_v51 = vpop.f32.mrb[18].mxu1 }
 0x2c9   :  { %v2130_v52 = vpop.f32.mrb[19].mxu1 }
 0x2ca   :  { %v1663_v54 = vadd.f32 %v2128_v50, %v2007_v53 }
 0x2e6   :  { %v1702_v55 = vpop.f32.mrb[20].mxu1 }
 0x2e7   :  { %v1703_v56 = vadd.f32 %v1702_v55, %v1663_v54  ;;  %v2174_v57 = vpop.f32.mrb[21].mxu1 }
 0x2e8   :  { %v1705_v58 = vpop.f32.mrb[22].mxu1 }
 0x2e9   :  { %v1708_v59 = vmax.f32 %v1703_v56, 0.0  ;;  %v2175_v60 = vpop.f32.mrb[23].mxu1 }
 0x2eb   :  { %v1709_v62 = vpack.c.bf16 %v1708_v59, %v1708_v59 }
 0x2ed   :  { %2193 = vmatmul.mubr.bf16.vlgmr.msra.gmra.mrb[24].mxu1 %v1709_v62 }
 0x3c0   :  { %v1815_v63 = vpop.f32.mrb[24].mxu1 }
 0x3c1   :  { %v1816_v0 = vadd.f32 %v2032_v61, %v1815_v63  ;;  %v2194_v1 = vpop.f32.mrb[25].mxu1 }
 0x3c2   :  { %v1818_v2 = vpop.f32.mrb[26].mxu1 }
 0x3c3   :  { %v1821_v4 = vmax.f32 %v1816_v0, 0.0  ;;  %v2195_v5 = vpop.f32.mrb[27].mxu1 }
 0x3c5   :  { %v1829_v6 = vadd.f32 %v2041_v3, %v1821_v4 }
 0x3c7   :  { %1830 = vmax.xlane.f32.xlu0 %v1829_v6 }
 0x454   :  { %v1831_v7 = vpop.xlane.xlu0 %1830 }
 0x455   :  { %v1832_v8 = vsub.f32 %v1829_v6, %v1831_v7 }
 0x457   :  { %v1833_v9 = vmul.f32 1.442695, %v1832_v8 }
 0x459   :  { %2450 = vpow2.f32 %v1833_v9 }
 0x463   :  { %v2451_v10 = vpop.eup %2450 }
 0x464   :  { %1835 = vadd.xlane.f32.xlu0 %v2451_v10 }
 0x4f1   :  { %v1836_v11 = vpop.xlane.xlu0 %1835 }
 0x4f2   :  { %2452 = vlog2.f32 %v1836_v11 }
 0x4fc   :  { %v2453_v12 = vpop.eup %2452 }
 0x4fd   :  { %v1838_v13 = vmul.f32 0.6931472, %v2453_v12 }
 0x4ff   :  { %v1839_v14 = vsub.f32 %v1832_v8, %v1838_v13 }
 0x501   :  { %1840 = vst [vmem:[#allocation10] sm:$0xff] %v1839_v14 }
 0x502   :  { %2553 = shalt.err (!%p2550_p8)
}
 0x503   :  { %s2554_s17 = scalar_lea.hbm %s2746_s8, 128 }
 0x504   :  { %p2555_p9 = scmp.ne.s32.totalorder %s2746_s8, %s2554_s17  ;;  %p2558_p10 = scmp.lt.u32.totalorder %s2554_s17, %s2746_s8 }
 0x506   :  { %p2560_p11 = pnand %p2558_p10, %p2555_p9 }
 0x508   :  { %2563 = shalt.err (!%p2560_p11)
}
 0x509   :  { %1850 = dma.vmem_to_hbm [thread:$0]  %s1848_s7, 128, %s2746_s8, [#allocation4]  }
 0x50a   :  { %2570 = dma.done.wait [#allocation4], 128  }
 0x50b   :  { %2571 = vsyncadd [#allocation4], 4294967168 }
 0x50c   :  { %1854 = vsyncpa [#allocation3], 1 }
 0x50d   :  { %1855 = vsyncpa [#allocation6], 1 }
 0x50e   :  { %1856 = vsyncpa [#allocation9], 1 }
 0x50f   :  { %1857 = vsyncpa [#allocation4], 1 }

// kernel: tpu_custom_call.1
= control target key start
LH: loop header
LB: loop body
LE: loop exit
PB: predicated region body
PF: predicated region fallthrough
CT: control target
= control target key end

     0   :  { %13 = vsyncpa [#allocation3], 0  ;;  %s2738_s0 = inlined_call_operand.hbm [shape: f32[8,784], index: 0, kind: input, shape index: {}]   ;;  %s2739_s1 = inlined_call_operand.vmem [shape: f32[1,128], index: 1, kind: input, shape index: {}]   ;;  %s2740_s2 = inlined_call_operand.hbm [shape: bf16[784,384], index: 2, kind: input, shape index: {}]   ;;  %s2741_s3 = inlined_call_operand.vmem [shape: f32[1,384], index: 3, kind: input, shape index: {}]   ;;  %s2742_s4 = inlined_call_operand.hbm [shape: bf16[384,128], index: 4, kind: input, shape index: {}]   ;;  %s2743_s5 = inlined_call_operand.vmem [shape: f32[1,128], index: 5, kind: input, shape index: {}]   ;;  %s2744_s6 = inlined_call_operand.hbm [shape: bf16[128,128], index: 6, kind: input, shape index: {}]   ;;  %s2745_s7 = inlined_call_operand.vmem [shape: f32[1,128], index: 7, kind: input, shape index: {}]   ;;  %s2746_s8 = inlined_call_operand.hbm [shape: f32[8,128], index: 8, kind: output, shape index: {}]  }
   0x1   :  { %14 = vsyncpa [#allocation6], 0 }
   0x2   :  { %15 = vsyncpa [#allocation9], 0 }
   0x3   :  { %16 = vsyncpa [#allocation4], 0  ;;  %s2572_s27 = smov [#allocation5]   ;;  %s2454_s9 = scalar_lea.hbm %s2740_s2, 18816 }
   0x4   :  { %s34_s28 = sshll.u32 %s2572_s27, 4  ;;  %p2455_p0 = scmp.ne.s32.totalorder %s2740_s2, %s2454_s9  ;;  %s35_s28 = int_to_ptr.vmem [resolvable:$true] %s34_s28 }
   0x5   :  { %p2458_p1 = scmp.lt.u32.totalorder %s2454_s9, %s2740_s2 }
   0x7   :  { %p2460_p2 = pnand %p2458_p1, %p2455_p0 }
   0x9   :  { %2463 = shalt.err (!%p2460_p2)
}
   0xa   :  { %s2464_s14 = scalar_lea.vmem %s35_s28, 18816  ;;  %p2469_p4 = scmp.lt.s32.totalorder %s35_s28, %s35_s28 }
   0xb   :  { %p2465_p3 = scmp.ne.s32.totalorder %s35_s28, %s2464_s14  ;;  %p2470_p5 = scmp.lt.s32.totalorder %s2464_s14, %s2464_s14 }
   0xd   :  { %p2471_p6 = por %p2470_p5, %p2469_p4 }
   0xf   :  { %p2472_p7 = pnand %p2471_p6, %p2465_p3 }
  0x11   :  { %2475 = shalt.err (!%p2472_p7)
}
  0x12   :  { %s2573_s15 = smov 192   ;;  %s2574_s16 = smov 12  }
  0x13   :  { %40 = dma.hbm_to_vmem [thread:$0]  %s2740_s2, 18816, %s35_s28, [#allocation6], %s2573_s15, %s2573_s15, %s2574_s16  }
  0x14   :  { %s2575_s19 = smov [#allocation2]   ;;  %s2576_s21 = smov [#allocation7]  }
  0x15   :  { %s23_s20 = sshll.u32 %s2575_s19, 4  ;;  %s48_s22 = sshll.u32 %s2576_s21, 4  ;;  %s24_s20 = int_to_ptr.vmem [resolvable:$true] %s23_s20  ;;  %s49_s22 = int_to_ptr.vmem [resolvable:$true] %s48_s22 }
  0x16   :  { %s2476_s25 = scalar_lea.hbm %s2738_s0, 896 }
  0x17   :  { %p2477_p8 = scmp.ne.s32.totalorder %s2738_s0, %s2476_s25  ;;  %p2480_p9 = scmp.lt.u32.totalorder %s2476_s25, %s2738_s0 }
  0x19   :  { %p2482_p10 = pnand %p2480_p9, %p2477_p8 }
  0x1b   :  { %2485 = shalt.err (!%p2482_p10)
}
  0x1c   :  { %s2486_s2 = scalar_lea.vmem %s24_s20, 896  ;;  %p2491_p12 = scmp.lt.s32.totalorder %s24_s20, %s24_s20 }
  0x1d   :  { %p2487_p11 = scmp.ne.s32.totalorder %s24_s20, %s2486_s2  ;;  %p2492_p13 = scmp.lt.s32.totalorder %s2486_s2, %s2486_s2 }
  0x1f   :  { %p2493_p0 = por %p2492_p13, %p2491_p12 }
  0x21   :  { %p2494_p1 = pnand %p2493_p0, %p2487_p11 }
  0x23   :  { %2497 = shalt.err (!%p2494_p1)
}
  0x24   :  { %26 = dma.hbm_to_vmem [thread:$0]  %s2738_s0, 896, %s24_s20, [#allocation3]  }
  0x25   :  { %s2498_s12 = scalar_lea.hbm %s2742_s4, 3072 }
  0x26   :  { %p2499_p2 = scmp.ne.s32.totalorder %s2742_s4, %s2498_s12  ;;  %p2502_p3 = scmp.lt.u32.totalorder %s2498_s12, %s2742_s4 }
  0x28   :  { %p2504_p4 = pnand %p2502_p3, %p2499_p2 }
  0x2a   :  { %2507 = shalt.err (!%p2504_p4)
}
  0x2b   :  { %s2508_s17 = scalar_lea.vmem %s49_s22, 3072  ;;  %p2513_p6 = scmp.lt.s32.totalorder %s49_s22, %s49_s22 }
  0x2c   :  { %p2509_p5 = scmp.ne.s32.totalorder %s49_s22, %s2508_s17  ;;  %p2514_p7 = scmp.lt.s32.totalorder %s2508_s17, %s2508_s17 }
  0x2e   :  { %p2515_p8 = por %p2514_p7, %p2513_p6 }
  0x30   :  { %p2516_p9 = pnand %p2515_p8, %p2509_p5 }
  0x32   :  { %2519 = shalt.err (!%p2516_p9)
}
  0x33   :  { %s2577_s0 = smov 64   ;;  %s2578_s18 = smov 4  }
  0x34   :  { %54 = dma.hbm_to_vmem [thread:$0]  %s2742_s4, 3072, %s49_s22, [#allocation6], %s2577_s0, %s2577_s0, %s2578_s18  }
  0x35   :  { %s2579_s21 = smov [#allocation8]   ;;  %s2520_s26 = scalar_lea.hbm %s2744_s6, 1024 }
  0x36   :  { %s62_s23 = sshll.u32 %s2579_s21, 4  ;;  %p2521_p10 = scmp.ne.s32.totalorder %s2744_s6, %s2520_s26  ;;  %s63_s23 = int_to_ptr.vmem [resolvable:$true] %s62_s23 }
  0x37   :  { %p2524_p11 = scmp.lt.u32.totalorder %s2520_s26, %s2744_s6 }
  0x39   :  { %p2526_p12 = pnand %p2524_p11, %p2521_p10 }
  0x3b   :  { %2529 = shalt.err (!%p2526_p12)
}
  0x3c   :  { %s2530_s28 = scalar_lea.vmem %s63_s23, 1024  ;;  %p2535_p0 = scmp.lt.s32.totalorder %s63_s23, %s63_s23 }
  0x3d   :  { %p2531_p13 = scmp.ne.s32.totalorder %s63_s23, %s2530_s28  ;;  %p2536_p1 = scmp.lt.s32.totalorder %s2530_s28, %s2530_s28 }
  0x3f   :  { %p2537_p2 = por %p2536_p1, %p2535_p0 }
  0x41   :  { %p2538_p3 = pnand %p2537_p2, %p2531_p13 }
  0x43   :  { %2541 = shalt.err (!%p2538_p3)
}
  0x44   :  { %68 = dma.hbm_to_vmem [thread:$0]  %s2744_s6, 1024, %s63_s23, [#allocation9], %s2577_s0, %s2577_s0, %s2578_s18  }
  0x45   :  { %2564 = dma.done.wait [#allocation3], 896  }
  0x46   :  { %2565 = vsyncadd [#allocation3], 4294966400 }
  0x47   :  { %2566 = dma.done.wait [#allocation6], 21888  }
  0x48   :  { %2567 = vsyncadd [#allocation6], 4294945408 }
  0x49   :  { %2568 = dma.done.wait [#allocation9], 1024  }
  0x4a   :  { %2569 = vsyncadd [#allocation9], 4294966272  ;;  %v2222_v0 = vld [vmem:[#allocation5 + $0x4] ss:$12 sps:$4 sm:$0xff]   ;;  %v2224_v1 = vld [vmem:[#allocation5] ss:$12 sps:$4 sm:$0xff]  }
  0x4b   :  { %1099 = vmatprep.subr.bf16.mxu0 %v2222_v0  ;;  %v2225_v2 = vld [vmem:[#allocation5 + $0x1c] ss:$12 sps:$4 sm:$0xff]   ;;  %v2227_v3 = vld [vmem:[#allocation5 + $0x18] ss:$12 sps:$4 sm:$0xff]   ;;  %v2228_v4 = vld [vmem:[#allocation5 + $0x34] ss:$12 sps:$4 sm:$0xff]  }
  0x4c   :  { %1100 = vmatpush1.bf16.msra.mxu0 %v2224_v1  ;;  %v2230_v5 = vld [vmem:[#allocation5 + $0x30] ss:$12 sps:$4 sm:$0xff]   ;;  %v2231_v6 = vld [vmem:[#allocation5 + $0x4c] ss:$12 sps:$4 sm:$0xff]   ;;  %v2233_v7 = vld [vmem:[#allocation5 + $0x48] ss:$12 sps:$4 sm:$0xff]  }
  0x4d   :  { %1101 = vmatprep.subr.bf16.mxu0 %v2225_v2  ;;  %v2234_v8 = vld [vmem:[#allocation5 + $0x64] ss:$12 sps:$4 sm:$0xff]   ;;  %v2236_v9 = vld [vmem:[#allocation5 + $0x60] ss:$12 sps:$4 sm:$0xff]   ;;  %v2237_v10 = vld [vmem:[#allocation5 + $0x7c] ss:$12 sps:$4 sm:$0xff]  }
  0x4e   :  { %v2239_v11 = vld [vmem:[#allocation5 + $0x78] ss:$12 sps:$4 sm:$0xff]   ;;  %v2240_v12 = vld [vmem:[#allocation5 + $0x94] ss:$12 sps:$4 sm:$0xff]   ;;  %v2242_v15 = vld [vmem:[#allocation5 + $0x90] ss:$12 sps:$4 sm:$0xff]  }
  0x4f   :  { %v85_v13 = vld [vmem:[#allocation2 + $0x8] sm:$0xff]  ;;  %v2243_v16 = vld [vmem:[#allocation5 + $0xac] ss:$12 sps:$4 sm:$0xff]   ;;  %v2249_v24 = vld [vmem:[#allocation5 + $0xdc] ss:$12 sps:$4 sm:$0xff]   ;;  %vm1095_vm0 = vcmask 130048  }
  0x50   :  { %1102 = vmatpush1.bf16.msra.mxu0 %v2227_v3  ;;  %v92_v14 = vpack.c.bf16 %v85_v13, %v85_v13  ;;  %v2276_v17 = vld [vmem:[#allocation5 + $0xc8] ss:$12 sps:$4 sm:$0xff]   ;;  %v2246_v20 = vld [vmem:[#allocation5 + $0xc4] ss:$12 sps:$4 sm:$0xff]   ;;  %v2281_v21 = vld [vmem:[#allocation5 + $0xe0] ss:$12 sps:$4 sm:$0xff]  }
  0x51   :  { %1103 = vmatprep.subr.bf16.mxu0 %v2228_v4  ;;  %v2277_v18 = vld [vmem:[#allocation5 + $0x8] ss:$12 sps:$4 sm:$0xff]   ;;  %2042 = vmatprep.subr.bf16.mxu1 %v2276_v17  ;;  %v2282_v22 = vld [vmem:[#allocation5 + $0x20] ss:$12 sps:$4 sm:$0xff]   ;;  %v2286_v25 = vld [vmem:[#allocation5 + $0xf8] ss:$12 sps:$4 sm:$0xff]  }
  0x52   :  { %1131 = vmatprep.mubr.bf16.mxu0 %v92_v14  ;;  %1295 = vmatprep.mubr.bf16.mxu1 %v92_v14  ;;  %v2245_v19 = vld [vmem:[#allocation5 + $0xa8] ss:$12 sps:$4 sm:$0xff]   ;;  %v2248_v23 = vld [vmem:[#allocation5 + $0xc0] ss:$12 sps:$4 sm:$0xff]   ;;  %v2287_v26 = vld [vmem:[#allocation5 + $0x38] ss:$12 sps:$4 sm:$0xff]  }
  0x53   :  { %2043 = vmatpush3.bf16.msra.mxu1 %v2277_v18  ;;  %v2251_v27 = vld [vmem:[#allocation5 + $0xd8] ss:$12 sps:$4 sm:$0xff]   ;;  %v2252_v28 = vld [vmem:[#allocation5 + $0xf4] ss:$12 sps:$4 sm:$0xff]   ;;  %v2291_v29 = vld [vmem:[#allocation5 + $0x110] ss:$12 sps:$4 sm:$0xff]  }
  0x54   :  { %1104 = vmatpush1.bf16.msra.mxu0 %v2230_v5  ;;  %2044 = vmatprep.subr.bf16.mxu1 %v2281_v21  ;;  %v2292_v30 = vld [vmem:[#allocation5 + $0x50] ss:$12 sps:$4 sm:$0xff]   ;;  %v2296_v32 = vld [vmem:[#allocation5 + $0x128] ss:$12 sps:$4 sm:$0xff]   ;;  %v2255_v33 = vld [vmem:[#allocation5 + $0x10c] ss:$12 sps:$4 sm:$0xff]  }
  0x55   :  { %1105 = vmatprep.subr.bf16.mxu0 %v2231_v6  ;;  %v2254_v31 = vld [vmem:[#allocation5 + $0xf0] ss:$12 sps:$4 sm:$0xff]   ;;  %v2297_v34 = vld [vmem:[#allocation5 + $0x68] ss:$12 sps:$4 sm:$0xff]   ;;  %v2301_v35 = vld [vmem:[#allocation5 + $0x140] ss:$12 sps:$4 sm:$0xff]  }
  0x56   :  { %v2257_v36 = vld [vmem:[#allocation5 + $0x108] ss:$12 sps:$4 sm:$0xff]   ;;  %v2258_v37 = vld [vmem:[#allocation5 + $0x124] ss:$12 sps:$4 sm:$0xff]   ;;  %v2302_v38 = vld [vmem:[#allocation5 + $0x80] ss:$12 sps:$4 sm:$0xff]  }
  0x57   :  { %2045 = vmatpush3.bf16.msra.mxu1 %v2282_v22  ;;  %v2306_v39 = vld [vmem:[#allocation5 + $0x158] ss:$12 sps:$4 sm:$0xff]   ;;  %v2260_v40 = vld [vmem:[#allocation5 + $0x120] ss:$12 sps:$4 sm:$0xff]   ;;  %v2261_v41 = vld [vmem:[#allocation5 + $0x13c] ss:$12 sps:$4 sm:$0xff]  }
  0x58   :  { %1106 = vmatpush1.bf16.msra.mxu0 %v2233_v7  ;;  %2046 = vmatprep.subr.bf16.mxu1 %v2286_v25  ;;  %v2307_v42 = vld [vmem:[#allocation5 + $0x98] ss:$12 sps:$4 sm:$0xff]   ;;  %v2311_v43 = vld [vmem:[#allocation5 + $0x170] ss:$12 sps:$4 sm:$0xff]   ;;  %v2264_v45 = vld [vmem:[#allocation5 + $0x154] ss:$12 sps:$4 sm:$0xff]  }
  0x59   :  { %1107 = vmatprep.subr.bf16.mxu0 %v2234_v8  ;;  %v2263_v44 = vld [vmem:[#allocation5 + $0x138] ss:$12 sps:$4 sm:$0xff]   ;;  %v2312_v46 = vld [vmem:[#allocation5 + $0xb0] ss:$12 sps:$4 sm:$0xff]   ;;  %v2316_v47 = vld [vmem:[#allocation5 + $0x248] ss:$12 sps:$4 sm:$0xff]  }
  0x5a   :  { %v2266_v48 = vld [vmem:[#allocation5 + $0x150] ss:$12 sps:$4 sm:$0xff]   ;;  %v84_v49 = vld [vmem:[#allocation2] sm:$0xff]  ;;  %v2326_v57 = vld [vmem:[#allocation5 + $0x278] ss:$12 sps:$4 sm:$0xff]   ;;  %vm2581_vm1 = vmmov 0  }
  0x5b   :  { %2047 = vmatpush3.bf16.msra.mxu1 %v2287_v26  ;;  %v2267_v50 = vld [vmem:[#allocation5 + $0x16c] ss:$12 sps:$4 sm:$0xff]   ;;  %v2317_v51 = vld [vmem:[#allocation5 + $0x188] ss:$12 sps:$4 sm:$0xff]   ;;  %v91_v52 = vpack.c.bf16 %v84_v49, %v84_v49  ;;  %v2272_v55 = vld [vmem:[#allocation5 + $0x184] ss:$12 sps:$4 sm:$0xff]  }
  0x5c   :  { %1108 = vmatpush1.bf16.msra.mxu0 %v2236_v9  ;;  %2048 = vmatprep.subr.bf16.mxu1 %v2291_v29  ;;  %v2321_v53 = vld [vmem:[#allocation5 + $0x260] ss:$12 sps:$4 sm:$0xff]   ;;  %v2269_v54 = vld [vmem:[#allocation5 + $0x168] ss:$12 sps:$4 sm:$0xff]   ;;  %v2327_v60 = vld [vmem:[#allocation5 + $0x1b8] ss:$12 sps:$4 sm:$0xff]  }
  0x5d   :  { %1109 = vmatprep.subr.bf16.mxu0 %v2237_v10  ;;  %v2322_v56 = vld [vmem:[#allocation5 + $0x1a0] ss:$12 sps:$4 sm:$0xff]   ;;  %v2275_v59 = vld [vmem:[#allocation5 + $0x19c] ss:$12 sps:$4 sm:$0xff]   ;;  %v2273_v62 = vld [vmem:[#allocation5 + $0x198] ss:$12 sps:$4 sm:$0xff]  }
  0x5e   :  { %v2270_v58 = vld [vmem:[#allocation5 + $0x180] ss:$12 sps:$4 sm:$0xff]   ;;  %v2331_v61 = vld [vmem:[#allocation5 + $0x290] ss:$12 sps:$4 sm:$0xff]   ;;  %v2336_v1 = vld [vmem:[#allocation5 + $0x2a8] ss:$12 sps:$4 sm:$0xff]  }
  0x5f   :  { %2049 = vmatpush3.bf16.msra.mxu1 %v2292_v30  ;;  %v2280_v63 = vld [vmem:[#allocation5 + $0x1b4] ss:$12 sps:$4 sm:$0xff]   ;;  %v2332_v0 = vld [vmem:[#allocation5 + $0x1d0] ss:$12 sps:$4 sm:$0xff]   ;;  %v2285_v3 = vld [vmem:[#allocation5 + $0x1cc] ss:$12 sps:$4 sm:$0xff]  }
  0x60   :  { %1110 = vmatpush1.bf16.msra.mxu0 %v2239_v11  ;;  %2050 = vmatprep.subr.bf16.mxu1 %v2296_v32  ;;  %v2278_v2 = vld [vmem:[#allocation5 + $0x1b0] ss:$12 sps:$4 sm:$0xff]   ;;  %v2337_v4 = vld [vmem:[#allocation5 + $0x1e8] ss:$12 sps:$4 sm:$0xff]   ;;  %v2341_v5 = vld [vmem:[#allocation5 + $0x2c0] ss:$12 sps:$4 sm:$0xff]  }
  0x61   :  { %1111 = vmatprep.subr.bf16.mxu0 %v2240_v12  ;;  %v87_v6 = vld [vmem:[#allocation2 + $0x18] sm:$0xff]  ;;  %v2283_v7 = vld [vmem:[#allocation5 + $0x1c8] ss:$12 sps:$4 sm:$0xff]   ;;  %v2352_v18 = vld [vmem:[#allocation5 + $0x230] ss:$12 sps:$4 sm:$0xff]  }
  0x62   :  { %v94_v8 = vpack.c.bf16 %v87_v6, %v87_v6  ;;  %v2290_v9 = vld [vmem:[#allocation5 + $0x1e4] ss:$12 sps:$4 sm:$0xff]   ;;  %v2342_v10 = vld [vmem:[#allocation5 + $0x200] ss:$12 sps:$4 sm:$0xff]   ;;  %v2295_v13 = vld [vmem:[#allocation5 + $0x1fc] ss:$12 sps:$4 sm:$0xff]  }
  0x63   :  { %2051 = vmatpush3.bf16.msra.mxu1 %v2297_v34  ;;  %v2346_v11 = vld [vmem:[#allocation5 + $0x2d8] ss:$12 sps:$4 sm:$0xff]   ;;  %v2288_v12 = vld [vmem:[#allocation5 + $0x1e0] ss:$12 sps:$4 sm:$0xff]   ;;  %v2298_v21 = vld [vmem:[#allocation5 + $0x210] ss:$12 sps:$4 sm:$0xff]  }
  0x64   :  { %1112 = vmatpush1.bf16.msra.mxu0 %v2242_v15  ;;  %2052 = vmatprep.subr.bf16.mxu1 %v2301_v35  ;;  %v2347_v14 = vld [vmem:[#allocation5 + $0x218] ss:$12 sps:$4 sm:$0xff]   ;;  %v2351_v15 = vld [vmem:[#allocation5 + $0x2f0] ss:$12 sps:$4 sm:$0xff]   ;;  %v2300_v17 = vld [vmem:[#allocation5 + $0x214] ss:$12 sps:$4 sm:$0xff]  }
  0x65   :  { %1113 = vmatprep.subr.bf16.mxu0 %v2243_v16  ;;  %v2293_v16 = vld [vmem:[#allocation5 + $0x1f8] ss:$12 sps:$4 sm:$0xff]   ;;  %v2361_v25 = vld [vmem:[#allocation5 + $0x3e0] ss:$12 sps:$4 sm:$0xff]   ;;  %v2303_v26 = vld [vmem:[#allocation5 + $0x228] ss:$12 sps:$4 sm:$0xff]  }
  0x66   :  { %v2305_v22 = vld [vmem:[#allocation5 + $0x22c] ss:$12 sps:$4 sm:$0xff]   ;;  %v2320_v35 = vld [vmem:[#allocation5 + $0x274] ss:$12 sps:$4 sm:$0xff]   ;;  %v2335_v49 = vld [vmem:[#allocation5 + $0x2bc] ss:$12 sps:$4 sm:$0xff]  }
  0x67   :  { %2053 = vmatpush3.bf16.msra.mxu1 %v2302_v38  ;;  %v2366_v29 = vld [vmem:[#allocation5 + $0x3f8] ss:$12 sps:$4 sm:$0xff]   ;;  %v2308_v30 = vld [vmem:[#allocation5 + $0x240] ss:$12 sps:$4 sm:$0xff]   ;;  %v2318_v38 = vld [vmem:[#allocation5 + $0x270] ss:$12 sps:$4 sm:$0xff]  }
  0x68   :  { %1114 = vmatpush1.bf16.msra.mxu0 %v2245_v19  ;;  %2054 = vmatprep.subr.bf16.mxu1 %v2306_v39  ;;  %v2356_v19 = vld [vmem:[#allocation5 + $0x3c8] ss:$12 sps:$4 sm:$0xff]   ;;  %v2367_v32 = vld [vmem:[#allocation5 + $0x338] ss:$12 sps:$4 sm:$0xff]  }
  0x69   :  { %1115 = vmatprep.subr.bf16.mxu0 %v2246_v20  ;;  %v86_v20 = vld [vmem:[#allocation2 + $0x10] sm:$0xff] }
  0x6a   :  { %v2313_v34 = vld [vmem:[#allocation5 + $0x258] ss:$12 sps:$4 sm:$0xff]  }
  0x6b   :  { %2055 = vmatpush3.bf16.msra.mxu1 %v2307_v42  ;;  %v2325_v39 = vld [vmem:[#allocation5 + $0x28c] ss:$12 sps:$4 sm:$0xff]   ;;  %v89_v42 = vld [vmem:[#allocation2 + $0x28] sm:$0xff] }
  0x6c   :  { %1116 = vmatpush1.bf16.msra.mxu0 %v2248_v23  ;;  %2056 = vmatprep.subr.bf16.mxu1 %v2311_v43  ;;  %v2357_v23 = vld [vmem:[#allocation5 + $0x308] ss:$12 sps:$4 sm:$0xff]   ;;  %v2365_v6 = vld [vmem:[#allocation5 + $0x34c] ss:$12 sps:$4 sm:$0xff]  }
  0x6d   :  { %1117 = vmatprep.subr.bf16.mxu0 %v2249_v24  ;;  %v2677_v24 = vpack.c.bf16 %v86_v20, %v86_v20  ;;  %v2323_v43 = vld [vmem:[#allocation5 + $0x288] ss:$12 sps:$4 sm:$0xff]  }
  0x6e   :  { %v2398_v20 = vld [vmem:[#allocation5 + $0x3f4] ss:$12 sps:$4 sm:$0xff]  }
  0x6f   :  { %2057 = vmatpush3.bf16.msra.mxu1 %v2312_v46  ;;  %v2382_v46 = vld [vmem:[#allocation5 + $0x380] ss:$12 sps:$4 sm:$0xff]  }
  0x70   :  { %1118 = vmatpush1.bf16.msra.mxu0 %v2251_v27  ;;  %2064 = vmatprep.subr.bf16.mxu1 %v2316_v47  ;;  %v2310_v27 = vld [vmem:[#allocation5 + $0x244] ss:$12 sps:$4 sm:$0xff]  }
  0x71   :  { %1119 = vmatprep.subr.bf16.mxu0 %v2252_v28  ;;  %v2362_v28 = vld [vmem:[#allocation5 + $0x320] ss:$12 sps:$4 sm:$0xff]   ;;  %v2386_v47 = vld [vmem:[#allocation5 + $0x458] ss:$12 sps:$4 sm:$0xff]  }
  0x72   :  { %1296 = vmatmul.mubr.bf16.vlgmr.msra.gmra.mrb[0].mxu1 %v91_v52 }
  0x73   :  { %2065 = vmatpush3.bf16.msra.mxu1 %v2317_v51  ;;  %1335 = vmatprep.mubr.bf16.mxu1 %v94_v8  ;;  %v2391_v51 = vld [vmem:[#allocation5 + $0x470] ss:$12 sps:$4 sm:$0xff]  }
  0x74   :  { %1120 = vmatpush1.bf16.msra.mxu0 %v2254_v31  ;;  %2066 = vmatprep.subr.bf16.mxu1 %v2321_v53  ;;  %v2315_v31 = vld [vmem:[#allocation5 + $0x25c] ss:$12 sps:$4 sm:$0xff]   ;;  %v2340_v53 = vld [vmem:[#allocation5 + $0x2d4] ss:$12 sps:$4 sm:$0xff]  }
  0x75   :  { %1121 = vmatprep.subr.bf16.mxu0 %v2255_v33  ;;  %v2371_v33 = vld [vmem:[#allocation5 + $0x410] ss:$12 sps:$4 sm:$0xff]  }
  0x77   :  { %2067 = vmatpush3.bf16.msra.mxu1 %v2322_v56  ;;  %v2338_v56 = vld [vmem:[#allocation5 + $0x2d0] ss:$12 sps:$4 sm:$0xff]  }
  0x78   :  { %1122 = vmatpush1.bf16.msra.mxu0 %v2257_v36  ;;  %2068 = vmatprep.subr.bf16.mxu1 %v2326_v57  ;;  %v2372_v36 = vld [vmem:[#allocation5 + $0x350] ss:$12 sps:$4 sm:$0xff]   ;;  %v2345_v57 = vld [vmem:[#allocation5 + $0x2ec] ss:$12 sps:$4 sm:$0xff]  }
  0x79   :  { %1123 = vmatprep.subr.bf16.mxu0 %v2258_v37  ;;  %v2376_v37 = vld [vmem:[#allocation5 + $0x428] ss:$12 sps:$4 sm:$0xff]  }
  0x7b   :  { %2069 = vmatpush3.bf16.msra.mxu1 %v2327_v60  ;;  %v2343_v60 = vld [vmem:[#allocation5 + $0x2e8] ss:$12 sps:$4 sm:$0xff]  }
  0x7c   :  { %1124 = vmatpush1.bf16.msra.mxu0 %v2260_v40  ;;  %2070 = vmatprep.subr.bf16.mxu1 %v2331_v61  ;;  %v2377_v40 = vld [vmem:[#allocation5 + $0x368] ss:$12 sps:$4 sm:$0xff]   ;;  %v2580_v61 = vmov 0.0  }
  0x7d   :  { %1125 = vmatprep.subr.bf16.mxu0 %v2261_v41  ;;  %v2381_v41 = vld [vmem:[#allocation5 + $0x440] ss:$12 sps:$4 sm:$0xff]  }
  0x7f   :  { %2071 = vmatpush3.bf16.msra.mxu1 %v2332_v0  ;;  %v2348_v0 = vld [vmem:[#allocation5 + $0x300] ss:$12 sps:$4 sm:$0xff]  }
  0x80   :  { %1126 = vmatpush1.bf16.msra.mxu0 %v2263_v44  ;;  %2072 = vmatprep.subr.bf16.mxu1 %v2336_v1  ;;  %v96_v44 = vpack.c.bf16 %v89_v42, %v89_v42  ;;  %v2355_v1 = vld [vmem:[#allocation5 + $0x31c] ss:$12 sps:$4 sm:$0xff]   ;;  %v2425_v42 = vld [vmem:[#allocation7 + $0x18] sm:$0xff]  }
  0x81   :  { %1127 = vmatprep.subr.bf16.mxu0 %v2264_v45  ;;  %v2330_v45 = vld [vmem:[#allocation5 + $0x2a4] ss:$12 sps:$4 sm:$0xff]  }
  0x83   :  { %2073 = vmatpush3.bf16.msra.mxu1 %v2337_v4  ;;  %v2360_v4 = vld [vmem:[#allocation5 + $0x334] ss:$12 sps:$4 sm:$0xff]  }
  0x84   :  { %1128 = vmatpush1.bf16.msra.mxu0 %v2266_v48  ;;  %2074 = vmatprep.subr.bf16.mxu1 %v2341_v5  ;;  %v2328_v48 = vld [vmem:[#allocation5 + $0x2a0] ss:$12 sps:$4 sm:$0xff]   ;;  %v2358_v5 = vld [vmem:[#allocation5 + $0x330] ss:$12 sps:$4 sm:$0xff]  }
  0x85   :  { %1129 = vmatprep.subr.bf16.mxu0 %v2267_v50  ;;  %v2387_v50 = vld [vmem:[#allocation5 + $0x398] ss:$12 sps:$4 sm:$0xff]  }
  0x87   :  { %2075 = vmatpush3.bf16.msra.mxu1 %v2342_v10  ;;  %v2375_v10 = vld [vmem:[#allocation5 + $0x37c] ss:$12 sps:$4 sm:$0xff]  }
  0x88   :  { %1130 = vmatpush1.bf16.msra.mxu0 %v2269_v54  ;;  %2076 = vmatprep.subr.bf16.mxu1 %v2346_v11  ;;  %v2392_v54 = vld [vmem:[#allocation5 + $0x3b0] ss:$12 sps:$4 sm:$0xff]   ;;  %v2373_v11 = vld [vmem:[#allocation5 + $0x378] ss:$12 sps:$4 sm:$0xff]  }
  0x89   :  { %1140 = vmatprep.subr.bf16.mxu0 %v2272_v55  ;;  %v88_v55 = vld [vmem:[#allocation2 + $0x20] sm:$0xff] }
  0x8b   :  { %1132 = vmatmul.mubr.bf16.vlgmr.msra.gmra.mrb[0].mxu0 %v91_v52  ;;  %2077 = vmatpush3.bf16.msra.mxu1 %v2347_v14  ;;  %v2333_v52 = vld [vmem:[#allocation5 + $0x2b8] ss:$12 sps:$4 sm:$0xff]  }
  0x8c   :  { %1141 = vmatpush1.bf16.msra.mxu0 %v2270_v58  ;;  %1172 = vmatprep.mubr.bf16.mxu0 %v94_v8  ;;  %v2399_v58 = vld [vmem:[#allocation5 + $0x488] ss:$12 sps:$4 sm:$0xff]   ;;  %v2370_v8 = vld [vmem:[#allocation5 + $0x364] ss:$12 sps:$4 sm:$0xff]   ;;  %v2385_v14 = vld [vmem:[#allocation5 + $0x3ac] ss:$12 sps:$4 sm:$0xff]  }
  0x8d   :  { %1142 = vmatprep.subr.bf16.mxu0 %v2275_v59  ;;  %2078 = vmatprep.subr.bf16.mxu1 %v2351_v15  ;;  %v2680_v59 = vpack.c.bf16 %v88_v55, %v88_v55  ;;  %v2383_v15 = vld [vmem:[#allocation5 + $0x3a8] ss:$12 sps:$4 sm:$0xff]  }
  0x8f   :  { %2079 = vmatpush3.bf16.msra.mxu1 %v2352_v18  ;;  %v2395_v18 = vld [vmem:[#allocation5 + $0x3dc] ss:$12 sps:$4 sm:$0xff]  }
  0x90   :  { %1143 = vmatpush1.bf16.msra.mxu0 %v2273_v62  ;;  %2086 = vmatprep.subr.bf16.mxu1 %v2356_v19  ;;  %v2350_v62 = vld [vmem:[#allocation5 + $0x304] ss:$12 sps:$4 sm:$0xff]  }
  0x91   :  { %1144 = vmatprep.subr.bf16.mxu0 %v2280_v63  ;;  %v90_v63 = vld [vmem:[#allocation2 + $0x30] sm:$0xff] }
  0x92   :  { %1336 = vmatmul.mubr.bf16.vlgmr.msra.gmra.mrb[4].mxu1 %v2677_v24  ;;  %v2393_v19 = vld [vmem:[#allocation5 + $0x3d8] ss:$12 sps:$4 sm:$0xff]  }
  0x93   :  { %2087 = vmatpush3.bf16.msra.mxu1 %v2357_v23  ;;  %1375 = vmatprep.mubr.bf16.mxu1 %v96_v44  ;;  %v2400_v23 = vld [vmem:[#allocation5 + $0x408] ss:$12 sps:$4 sm:$0xff]  }
  0x94   :  { %1145 = vmatpush1.bf16.msra.mxu0 %v2278_v2  ;;  %2088 = vmatprep.subr.bf16.mxu1 %v2361_v25  ;;  %v2686_v2 = vpack.c.bf16 %v90_v63, %v90_v63  ;;  %v2403_v25 = vld [vmem:[#allocation5 + $0x420] ss:$12 sps:$4 sm:$0xff]  }
  0x95   :  { %1146 = vmatprep.subr.bf16.mxu0 %v2285_v3  ;;  %v2353_v3 = vld [vmem:[#allocation5 + $0x318] ss:$12 sps:$4 sm:$0xff]  }
  0x97   :  { %2089 = vmatpush3.bf16.msra.mxu1 %v2362_v28  ;;  %v2411_v28 = vld [vmem:[#allocation5 + $0x454] ss:$12 sps:$4 sm:$0xff]  }
  0x98   :  { %1147 = vmatpush1.bf16.msra.mxu0 %v2283_v7  ;;  %2090 = vmatprep.subr.bf16.mxu1 %v2366_v29  ;;  %v2363_v7 = vld [vmem:[#allocation5 + $0x348] ss:$12 sps:$4 sm:$0xff]   ;;  %v2409_v29 = vld [vmem:[#allocation5 + $0x450] ss:$12 sps:$4 sm:$0xff]  }
  0x99   :  { %1148 = vmatprep.subr.bf16.mxu0 %v2290_v9  ;;  %v2368_v9 = vld [vmem:[#allocation5 + $0x360] ss:$12 sps:$4 sm:$0xff]  }
  0x9b   :  { %2091 = vmatpush3.bf16.msra.mxu1 %v2367_v32  ;;  %v2417_v32 = vld [vmem:[#allocation5 + $0x484] ss:$12 sps:$4 sm:$0xff]  }
  0x9c   :  { %1149 = vmatpush1.bf16.msra.mxu0 %v2288_v12  ;;  %2092 = vmatprep.subr.bf16.mxu1 %v2371_v33  ;;  %v2380_v12 = vld [vmem:[#allocation5 + $0x394] ss:$12 sps:$4 sm:$0xff]  }
  0x9d   :  { %1150 = vmatprep.subr.bf16.mxu0 %v2295_v13  ;;  %v2378_v13 = vld [vmem:[#allocation5 + $0x390] ss:$12 sps:$4 sm:$0xff]   ;;  %v2415_v33 = vld [vmem:[#allocation5 + $0x480] ss:$12 sps:$4 sm:$0xff]  }
  0x9f   :  { %2093 = vmatpush3.bf16.msra.mxu1 %v2372_v36  ;;  %v2419_v36 = vld [vmem:[#allocation7] sm:$0xff]  }
  0xa0   :  { %1151 = vmatpush1.bf16.msra.mxu0 %v2293_v16  ;;  %2094 = vmatprep.subr.bf16.mxu1 %v2376_v37  ;;  %v2390_v16 = vld [vmem:[#allocation5 + $0x3c4] ss:$12 sps:$4 sm:$0xff]  }
  0xa1   :  { %1152 = vmatprep.subr.bf16.mxu0 %v2300_v17  ;;  %v2388_v17 = vld [vmem:[#allocation5 + $0x3c0] ss:$12 sps:$4 sm:$0xff]  }
  0xa2   :  { %v2420_v37 = vld [vmem:[#allocation7 + $0x48] sm:$0xff]  }
  0xa3   :  { %2095 = vmatpush3.bf16.msra.mxu1 %v2377_v40  ;;  %v2423_v40 = vld [vmem:[#allocation7 + $0x10] sm:$0xff]  }
  0xa4   :  { %1153 = vmatpush1.bf16.msra.mxu0 %v2298_v21  ;;  %2096 = vmatprep.subr.bf16.mxu1 %v2381_v41  ;;  %v2396_v21 = vld [vmem:[#allocation5 + $0x3f0] ss:$12 sps:$4 sm:$0xff]  }
  0xa5   :  { %1154 = vmatprep.subr.bf16.mxu0 %v2305_v22  ;;  %v2402_v22 = vld [vmem:[#allocation5 + $0x40c] ss:$12 sps:$4 sm:$0xff]   ;;  %v2424_v41 = vld [vmem:[#allocation7 + $0x58] sm:$0xff]  }
  0xa7   :  { %2097 = vmatpush3.bf16.msra.mxu1 %v2382_v46  ;;  %v2429_v46 = vld [vmem:[#allocation7 + $0x28] sm:$0xff]  }
  0xa8   :  { %1155 = vmatpush1.bf16.msra.mxu0 %v2303_v26  ;;  %2098 = vmatprep.subr.bf16.mxu1 %v2386_v47  ;;  %v2408_v26 = vld [vmem:[#allocation5 + $0x43c] ss:$12 sps:$4 sm:$0xff]  }
  0xa9   :  { %1156 = vmatprep.subr.bf16.mxu0 %v2310_v27  ;;  %v2406_v27 = vld [vmem:[#allocation5 + $0x438] ss:$12 sps:$4 sm:$0xff]  }
  0xab   :  { %2099 = vmatpush3.bf16.msra.mxu1 %v2387_v50 }
  0xac   :  { %1157 = vmatpush1.bf16.msra.mxu0 %v2308_v30  ;;  %2100 = vmatprep.subr.bf16.mxu1 %v2391_v51  ;;  %v2414_v30 = vld [vmem:[#allocation5 + $0x46c] ss:$12 sps:$4 sm:$0xff]  }
  0xad   :  { %1158 = vmatprep.subr.bf16.mxu0 %v2315_v31  ;;  %v2412_v31 = vld [vmem:[#allocation5 + $0x468] ss:$12 sps:$4 sm:$0xff]  }
  0xaf   :  { %2101 = vmatpush3.bf16.msra.mxu1 %v2392_v54  ;;  %v2431_v54 = vld [vmem:[#allocation7 + $0x30] sm:$0xff]  }
  0xb0   :  { %1159 = vmatpush1.bf16.msra.mxu0 %v2313_v34  ;;  %2150 = vmatprep.subr.bf16.mxu1 %v2580_v61  ;;  %v2582_v34 = vmov 0  }
  0xb1   :  { %1160 = vmatprep.subr.bf16.mxu0 %v2320_v35  ;;  %v2418_v35 = vld [vmem:[#allocation7 + $0x40] sm:$0xff]  }
  0xb2   :  { %1376 = vmatmul.mubr.bf16.vlgmr.msra.gmra.mrb[8].mxu1 %v2680_v59 }
  0xb3   :  { %2151 = vmatpush3.bf16.msra.mxu1 %v2399_v58  ;;  %2152 = vmatprep.mubr.msk.bf16.mxu1 %vm2581_vm1, %v2580_v61 }
  0xb4   :  { %1161 = vmatpush1.bf16.msra.mxu0 %v2318_v38  ;;  %2110 = vmatprep.subr.bf16.mxu1 %v2418_v35  ;;  %v2421_v38 = vld [vmem:[#allocation7 + $0x8] sm:$0xff]  }
  0xb5   :  { %1162 = vmatprep.subr.bf16.mxu0 %v2325_v39  ;;  %v2422_v39 = vld [vmem:[#allocation7 + $0x50] sm:$0xff]   ;;  %v2439_v35 = vld [vmem:[#allocation7 + $0xa8] sm:$0xff]  }
  0xb8   :  { %1163 = vmatpush1.bf16.msra.mxu0 %v2323_v43  ;;  %v2426_v43 = vld [vmem:[#allocation7 + $0x60] sm:$0xff]  }
  0xb9   :  { %1164 = vmatprep.subr.bf16.mxu0 %v2330_v45  ;;  %v2428_v45 = vld [vmem:[#allocation7 + $0x68] sm:$0xff]  }
  0xba   :  { %2153 = vmatmul.mubr.msk.bf16.vlgmr.msra.gmra.mrb[12].mxu1 %vm1095_vm0, %v2686_v2 }
  0xbb   :  { %2111 = vmatpush3.bf16.msra.mxu1 %v2419_v36  ;;  %v2440_v36 = vld [vmem:[#allocation7 + $0xb0] sm:$0xff]  }
  0xbc   :  { %1165 = vmatpush1.bf16.msra.mxu0 %v2328_v48  ;;  %2112 = vmatprep.subr.bf16.mxu1 %v2420_v37  ;;  %v2441_v37 = vld [vmem:[#allocation7 + $0xb8] sm:$0xff]  }
  0xbd   :  { %1166 = vmatprep.subr.bf16.mxu0 %v2335_v49 }
  0xbf   :  { %2113 = vmatpush3.bf16.msra.mxu1 %v2421_v38 }
  0xc0   :  { %1167 = vmatpush1.bf16.msra.mxu0 %v2333_v52  ;;  %2114 = vmatprep.subr.bf16.mxu1 %v2422_v39  ;;  %v296_v52 = vlaneseq }
  0xc1   :  { %1168 = vmatprep.subr.bf16.mxu0 %v2340_v53  ;;  %v2430_v53 = vld [vmem:[#allocation7 + $0x70] sm:$0xff]  }
  0xc2   :  { %v297_v55 = vshrl.u32 %v296_v52, 7 }
  0xc3   :  { %2115 = vmatpush3.bf16.msra.mxu1 %v2423_v40  ;;  %v2442_v40 = vld [vmem:[#allocation8] sm:$0xff]  }
  0xc4   :  { %1169 = vmatpush1.bf16.msra.mxu0 %v2338_v56  ;;  %2116 = vmatprep.subr.bf16.mxu1 %v2424_v41  ;;  %v2432_v56 = vld [vmem:[#allocation7 + $0x78] sm:$0xff]   ;;  %v306_v58 = vsub.s32 2, %v297_v55  ;;  %v2443_v41 = vld [vmem:[#allocation8 + $0x8] sm:$0xff]  }
  0xc5   :  { %1170 = vmatprep.subr.bf16.mxu0 %v2345_v57  ;;  %v2433_v57 = vld [vmem:[#allocation7 + $0x38] sm:$0xff]  }
  0xc7   :  { %2117 = vmatpush3.bf16.msra.mxu1 %v2425_v42  ;;  %v2444_v42 = vld [vmem:[#allocation8 + $0x10] sm:$0xff]  }
  0xc8   :  { %1171 = vmatpush1.bf16.msra.mxu0 %v2343_v60  ;;  %2118 = vmatprep.subr.bf16.mxu1 %v2426_v43  ;;  %v2445_v43 = vld [vmem:[#allocation8 + $0x18] sm:$0xff]  }
  0xc9   :  { %1181 = vmatprep.subr.bf16.mxu0 %v2350_v62 }
  0xcb   :  { %1173 = vmatmul.mubr.bf16.vlgmr.msra.gmra.mrb[0].mxu0 %v2677_v24  ;;  %v2405_v24 = vld [vmem:[#allocation5 + $0x424] ss:$12 sps:$4 sm:$0xff]  }
  0xcc   :  { %1182 = vmatpush1.bf16.msra.mxu0 %v2348_v0  ;;  %1213 = vmatprep.mubr.bf16.mxu0 %v96_v44  ;;  %v2427_v44 = vld [vmem:[#allocation7 + $0x20] sm:$0xff]  }
  0xcd   :  { %1183 = vmatprep.subr.bf16.mxu0 %v2355_v1  ;;  %2119 = vmatpush3.bf16.msra.mxu1 %v2427_v44  ;;  %v2446_v44 = vld [vmem:[#allocation8 + $0x20] sm:$0xff]  }
  0xce   :  { %2120 = vmatprep.subr.bf16.mxu1 %v2428_v45  ;;  %v2447_v45 = vld [vmem:[#allocation8 + $0x28] sm:$0xff]  }
  0xd0   :  { %1184 = vmatpush1.bf16.msra.mxu0 %v2353_v3 }
  0xd1   :  { %1185 = vmatprep.subr.bf16.mxu0 %v2360_v4  ;;  %2121 = vmatpush3.bf16.msra.mxu1 %v2429_v46  ;;  %v2448_v46 = vld [vmem:[#allocation8 + $0x30] sm:$0xff]  }
  0xd2   :  { %2122 = vmatprep.subr.bf16.mxu1 %v2430_v53  ;;  %v2007_v53 = vld [vmem:[%s2743_s5] ss:$0 sm:$0xff]  ;;  %s2583_s5 = smov [#allocation10]  }
  0xd4   :  { %1186 = vmatpush1.bf16.msra.mxu0 %v2358_v5 }
  0xd5   :  { %1187 = vmatprep.subr.bf16.mxu0 %v2365_v6  ;;  %2123 = vmatpush3.bf16.msra.mxu1 %v2431_v54 }
  0xd6   :  { %2124 = vmatprep.subr.bf16.mxu1 %v2432_v56 }
  0xd8   :  { %1188 = vmatpush1.bf16.msra.mxu0 %v2363_v7 }
  0xd9   :  { %1189 = vmatprep.subr.bf16.mxu0 %v2370_v8  ;;  %2125 = vmatpush3.bf16.msra.mxu1 %v2433_v57 }
  0xda   :  { %2156 = vmatprep.subr.bf16.mxu1 %v2580_v61 }
  0xdc   :  { %1190 = vmatpush1.bf16.msra.mxu0 %v2368_v9 }
  0xdd   :  { %1191 = vmatprep.subr.bf16.mxu0 %v2375_v10 }
  0xe0   :  { %1192 = vmatpush1.bf16.msra.mxu0 %v2373_v11 }
  0xe1   :  { %1193 = vmatprep.subr.bf16.mxu0 %v2380_v12 }
  0xe4   :  { %1194 = vmatpush1.bf16.msra.mxu0 %v2378_v13 }
  0xe5   :  { %1195 = vmatprep.subr.bf16.mxu0 %v2385_v14 }
  0xe8   :  { %1196 = vmatpush1.bf16.msra.mxu0 %v2383_v15 }
  0xe9   :  { %1197 = vmatprep.subr.bf16.mxu0 %v2390_v16  ;;  %v298_v16 = vsub.s32 0, %v297_v55 }
  0xec   :  { %1198 = vmatpush1.bf16.msra.mxu0 %v2388_v17  ;;  %v302_v17 = vsub.s32 1, %v297_v55 }
  0xed   :  { %1199 = vmatprep.subr.bf16.mxu0 %v2395_v18 }
  0xf0   :  { %1200 = vmatpush1.bf16.msra.mxu0 %v2393_v19 }
  0xf1   :  { %1201 = vmatprep.subr.bf16.mxu0 %v2398_v20 }
  0xf4   :  { %1202 = vmatpush1.bf16.msra.mxu0 %v2396_v21 }
  0xf5   :  { %1203 = vmatprep.subr.bf16.mxu0 %v2402_v22 }
  0xf8   :  { %1204 = vmatpush1.bf16.msra.mxu0 %v2400_v23 }
  0xf9   :  { %1205 = vmatprep.subr.bf16.mxu0 %v2405_v24 }
  0xfc   :  { %1206 = vmatpush1.bf16.msra.mxu0 %v2403_v25 }
  0xfd   :  { %1207 = vmatprep.subr.bf16.mxu0 %v2408_v26 }
 0x100   :  { %1208 = vmatpush1.bf16.msra.mxu0 %v2406_v27 }
 0x101   :  { %1209 = vmatprep.subr.bf16.mxu0 %v2411_v28 }
 0x104   :  { %1210 = vmatpush1.bf16.msra.mxu0 %v2409_v29  ;;  %v2434_v29 = vld [vmem:[#allocation7 + $0x80] sm:$0xff]  }
 0x105   :  { %1211 = vmatprep.subr.bf16.mxu0 %v2414_v30 }
 0x108   :  { %1212 = vmatpush1.bf16.msra.mxu0 %v2412_v31  ;;  %v2435_v31 = vld [vmem:[#allocation7 + $0x88] sm:$0xff]  }
 0x109   :  { %1222 = vmatprep.subr.bf16.mxu0 %v2417_v32  ;;  %v2436_v32 = vld [vmem:[#allocation7 + $0x90] sm:$0xff]  }
 0x10b   :  { %1214 = vmatmul.mubr.bf16.vlgmr.msra.gmra.mrb[0].mxu0 %v2680_v59  ;;  %v294_v59 = vld [vmem:[%s2741_s3] sm:$0x7] }
 0x10c   :  { %1223 = vmatpush1.bf16.msra.mxu0 %v2415_v33  ;;  %1254 = vmatprep.mubr.bf16.mxu0 %v2582_v34  ;;  %v307_v60 = vrot.slane %v294_v59, %v306_v58  ;;  %v299_v18 = vrot.slane %v294_v59, %v298_v16  ;;  %v303_v19 = vrot.slane %v294_v59, %v302_v17  ;;  %v2437_v33 = vld [vmem:[#allocation7 + $0x98] sm:$0xff]   ;;  %v2438_v34 = vld [vmem:[#allocation7 + $0xa0] sm:$0xff]  }
 0x117   :  { %2005 = vmatmul.mubr.msk.bf16.vlgmr.msra.gmra.mrb[0].mxu0 %vm1095_vm0, %v2686_v2 }
 0x145   :  { %v2058_v47 = vpop.f32.mrb[0].mxu1 }
 0x146   :  { %v2059_v48 = vpop.f32.mrb[1].mxu1 }
 0x147   :  { %v2060_v49 = vadd.f32 %v2059_v48, %v2058_v47  ;;  %v2061_v50 = vpop.f32.mrb[2].mxu1  ;;  %v2449_v47 = vld [vmem:[#allocation8 + $0x38] sm:$0xff]  }
 0x148   :  { %v2062_v51 = vpop.f32.mrb[3].mxu1 }
 0x149   :  { %v1298_v62 = vadd.f32 %v2060_v49, %v307_v60 }
 0x165   :  { %v2080_v63 = vpop.f32.mrb[4].mxu1 }
 0x166   :  { %v2081_v0 = vpop.f32.mrb[5].mxu1 }
 0x167   :  { %v2082_v1 = vadd.f32 %v2081_v0, %v2080_v63  ;;  %v2083_v2 = vpop.f32.mrb[6].mxu1 }
 0x168   :  { %v2084_v3 = vpop.f32.mrb[7].mxu1 }
 0x169   :  { %v1338_v4 = vadd.f32 %v2082_v1, %v1298_v62  ;;  %v2041_v3 = vld [vmem:[%s2739_s1] ss:$0 sm:$0xff] }
 0x185   :  { %v2102_v5 = vpop.f32.mrb[8].mxu1 }
 0x186   :  { %v2103_v6 = vpop.f32.mrb[9].mxu1 }
 0x187   :  { %v2104_v7 = vadd.f32 %v2103_v6, %v2102_v5  ;;  %v2105_v8 = vpop.f32.mrb[10].mxu1 }
 0x188   :  { %v2106_v9 = vpop.f32.mrb[11].mxu1 }
 0x189   :  { %v1378_v10 = vadd.f32 %v2104_v7, %v1338_v4 }
 0x18d   :  { %v1417_v11 = vpop.f32.mrb[12].mxu1 }
 0x18e   :  { %v1418_v12 = vadd.f32 %v1417_v11, %v1378_v10  ;;  %v2154_v13 = vpop.f32.mrb[13].mxu1 }
 0x18f   :  { %v1420_v14 = vpop.f32.mrb[14].mxu1 }
 0x190   :  { %v2155_v15 = vpop.f32.mrb[15].mxu1  ;;  %v1425_v38 = vmax.f32 %v1418_v12, 0.0 }
 0x192   :  { %v1428_v39 = vpack.c.bf16 %v1425_v38, %v1425_v38 }
 0x1ea   :  { %v1256_v20 = vpop.f32.mrb[0].mxu0 }
 0x1eb   :  { %v2196_v21 = vadd.f32 %v1256_v20, %v299_v18  ;;  %v1258_v22 = vpop.f32.mrb[1].mxu0 }
 0x1ec   :  { %v2197_v23 = vadd.f32 %v1258_v22, %v303_v19  ;;  %v1260_v24 = vpop.f32.mrb[2].mxu0 }
 0x1ed   :  { %v1423_v25 = vmax.f32 %v2196_v21, 0.0  ;;  %v1261_v26 = vpop.f32.mrb[3].mxu0 }
 0x1ee   :  { %v1424_v27 = vmax.f32 %v2197_v23, 0.0 }
 0x1ef   :  { %v1426_v30 = vpack.c.bf16 %v1423_v25, %v1423_v25 }
 0x1f0   :  { %v1427_v28 = vpack.c.bf16 %v1424_v27, %v1424_v27 }
 0x1f2   :  { %1660 = vmatprep.mubr.bf16.mxu1 %v1427_v28 }
 0x1f3   :  { %1661 = vmatmul.mubr.bf16.vlgmr.msra.gmra.mrb[16].mxu1 %v1426_v30 }
 0x1f4   :  { %2157 = vmatpush3.bf16.msra.mxu1 %v2434_v29  ;;  %2172 = vmatprep.mubr.msk.bf16.mxu1 %vm2581_vm1, %v2580_v61 }
 0x1f5   :  { %2158 = vmatprep.subr.bf16.mxu1 %v2580_v61 }
 0x1f8   :  { %2159 = vmatpush3.bf16.msra.mxu1 %v2435_v31 }
 0x1f9   :  { %2160 = vmatprep.subr.bf16.mxu1 %v2580_v61 }
 0x1fc   :  { %2161 = vmatpush3.bf16.msra.mxu1 %v2436_v32 }
 0x1fd   :  { %2162 = vmatprep.subr.bf16.mxu1 %v2580_v61 }
 0x200   :  { %2163 = vmatpush3.bf16.msra.mxu1 %v2437_v33 }
 0x201   :  { %2164 = vmatprep.subr.bf16.mxu1 %v2580_v61 }
 0x204   :  { %2165 = vmatpush3.bf16.msra.mxu1 %v2438_v34 }
 0x205   :  { %2166 = vmatprep.subr.bf16.mxu1 %v2580_v61 }
 0x208   :  { %2167 = vmatpush3.bf16.msra.mxu1 %v2439_v35 }
 0x209   :  { %2168 = vmatprep.subr.bf16.mxu1 %v2580_v61 }
 0x20c   :  { %2169 = vmatpush3.bf16.msra.mxu1 %v2440_v36 }
 0x20d   :  { %2170 = vmatprep.subr.bf16.mxu1 %v2580_v61 }
 0x210   :  { %2171 = vmatpush3.bf16.msra.mxu1 %v2441_v37 }
 0x211   :  { %2176 = vmatprep.subr.bf16.mxu1 %v2580_v61 }
 0x213   :  { %2173 = vmatmul.mubr.bf16.vlgmr.msra.gmra.mrb[20].mxu1 %v1428_v39 }
 0x214   :  { %2192 = vmatprep.mubr.msk.bf16.mxu1 %vm2581_vm1, %v2580_v61  ;;  %2177 = vmatpush3.bf16.msra.mxu1 %v2442_v40 }
 0x215   :  { %2178 = vmatprep.subr.bf16.mxu1 %v2580_v61 }
 0x218   :  { %2179 = vmatpush3.bf16.msra.mxu1 %v2443_v41 }
 0x219   :  { %2180 = vmatprep.subr.bf16.mxu1 %v2580_v61 }
 0x21c   :  { %2181 = vmatpush3.bf16.msra.mxu1 %v2444_v42 }
 0x21d   :  { %2182 = vmatprep.subr.bf16.mxu1 %v2580_v61 }
 0x220   :  { %2183 = vmatpush3.bf16.msra.mxu1 %v2445_v43 }
 0x221   :  { %2184 = vmatprep.subr.bf16.mxu1 %v2580_v61 }
 0x224   :  { %2185 = vmatpush3.bf16.msra.mxu1 %v2446_v44 }
 0x225   :  { %2186 = vmatprep.subr.bf16.mxu1 %v2580_v61 }
 0x228   :  { %2187 = vmatpush3.bf16.msra.mxu1 %v2447_v45 }
 0x229   :  { %2188 = vmatprep.subr.bf16.mxu1 %v2580_v61 }
 0x22c   :  { %2189 = vmatpush3.bf16.msra.mxu1 %v2448_v46 }
 0x22d   :  { %2190 = vmatprep.subr.bf16.mxu1 %v2580_v61  ;;  %v2032_v61 = vld [vmem:[%s2745_s7] ss:$0 sm:$0xff]  ;;  %s1847_s7 = sshll.u32 %s2583_s5, 4  ;;  %s1848_s7 = int_to_ptr.vmem [resolvable:$true] %s1847_s7 }
 0x22e   :  { %s2542_s1 = scalar_lea.vmem %s1848_s7, 128  ;;  %p2547_p5 = scmp.lt.s32.totalorder %s1848_s7, %s1848_s7 }
 0x22f   :  { %p2543_p4 = scmp.ne.s32.totalorder %s1848_s7, %s2542_s1  ;;  %p2548_p6 = scmp.lt.s32.totalorder %s2542_s1, %s2542_s1 }
 0x230   :  { %2191 = vmatpush3.bf16.msra.mxu1 %v2449_v47 }
 0x231   :  { %p2549_p7 = por %p2548_p6, %p2547_p5 }
 0x233   :  { %p2550_p8 = pnand %p2549_p7, %p2543_p4 }
 0x2c6   :  { %v2126_v48 = vpop.f32.mrb[16].mxu1 }
 0x2c7   :  { %v2127_v49 = vpop.f32.mrb[17].mxu1 }
 0x2c8   :  { %v2128_v50 = vadd.f32 %v2127_v49, %v2126_v48  ;;  %v2129_v51 = vpop.f32.mrb[18].mxu1 }
 0x2c9   :  { %v2130_v52 = vpop.f32.mrb[19].mxu1 }
 0x2ca   :  { %v1663_v54 = vadd.f32 %v2128_v50, %v2007_v53 }
 0x2e6   :  { %v1702_v55 = vpop.f32.mrb[20].mxu1 }
 0x2e7   :  { %v1703_v56 = vadd.f32 %v1702_v55, %v1663_v54  ;;  %v2174_v57 = vpop.f32.mrb[21].mxu1 }
 0x2e8   :  { %v1705_v58 = vpop.f32.mrb[22].mxu1 }
 0x2e9   :  { %v1708_v59 = vmax.f32 %v1703_v56, 0.0  ;;  %v2175_v60 = vpop.f32.mrb[23].mxu1 }
 0x2eb   :  { %v1709_v62 = vpack.c.bf16 %v1708_v59, %v1708_v59 }
 0x2ed   :  { %2193 = vmatmul.mubr.bf16.vlgmr.msra.gmra.mrb[24].mxu1 %v1709_v62 }
 0x3c0   :  { %v1815_v63 = vpop.f32.mrb[24].mxu1 }
 0x3c1   :  { %v1816_v0 = vadd.f32 %v2032_v61, %v1815_v63  ;;  %v2194_v1 = vpop.f32.mrb[25].mxu1 }
 0x3c2   :  { %v1818_v2 = vpop.f32.mrb[26].mxu1 }
 0x3c3   :  { %v1821_v4 = vmax.f32 %v1816_v0, 0.0  ;;  %v2195_v5 = vpop.f32.mrb[27].mxu1 }
 0x3c5   :  { %v1829_v6 = vadd.f32 %v2041_v3, %v1821_v4 }
 0x3c7   :  { %1830 = vmax.xlane.f32.xlu0 %v1829_v6 }
 0x454   :  { %v1831_v7 = vpop.xlane.xlu0 %1830 }
 0x455   :  { %v1832_v8 = vsub.f32 %v1829_v6, %v1831_v7 }
 0x457   :  { %v1833_v9 = vmul.f32 1.442695, %v1832_v8 }
 0x459   :  { %2450 = vpow2.f32 %v1833_v9 }
 0x463   :  { %v2451_v10 = vpop.eup %2450 }
 0x464   :  { %1835 = vadd.xlane.f32.xlu0 %v2451_v10 }
 0x4f1   :  { %v1836_v11 = vpop.xlane.xlu0 %1835 }
 0x4f2   :  { %2452 = vlog2.f32 %v1836_v11 }
 0x4fc   :  { %v2453_v12 = vpop.eup %2452 }
 0x4fd   :  { %v1838_v13 = vmul.f32 0.6931472, %v2453_v12 }
 0x4ff   :  { %v1839_v14 = vsub.f32 %v1832_v8, %v1838_v13 }
 0x501   :  { %1840 = vst [vmem:[#allocation10] sm:$0xff] %v1839_v14 }
 0x502   :  { %2553 = shalt.err (!%p2550_p8)
}
 0x503   :  { %s2554_s17 = scalar_lea.hbm %s2746_s8, 128 }
 0x504   :  { %p2555_p9 = scmp.ne.s32.totalorder %s2746_s8, %s2554_s17  ;;  %p2558_p10 = scmp.lt.u32.totalorder %s2554_s17, %s2746_s8 }
 0x506   :  { %p2560_p11 = pnand %p2558_p10, %p2555_p9 }
 0x508   :  { %2563 = shalt.err (!%p2560_p11)
}
 0x509   :  { %1850 = dma.vmem_to_hbm [thread:$0]  %s1848_s7, 128, %s2746_s8, [#allocation4]  }
 0x50a   :  { %2570 = dma.done.wait [#allocation4], 128  }
 0x50b   :  { %2571 = vsyncadd [#allocation4], 4294967168 }
 0x50c   :  { %1854 = vsyncpa [#allocation3], 1 }
 0x50d   :  { %1855 = vsyncpa [#allocation6], 1 }
 0x50e   :  { %1856 = vsyncpa [#allocation9], 1 }
 0x50f   :  { %1857 = vsyncpa [#allocation4], 1 }

</bundles_post_ra>
